<compile_context>
chip_gen: v5e
topology: v5e:2x2
jax: 0.10.0
libtpu: 0.0.40
codegen_flags: <defaults>
</compile_context>

<pallas_src>
import functools

import jax
import jax.numpy as jnp
from jax import lax
from jax.experimental import pallas as pl
from jax.experimental.pallas import tpu as pltpu


# ----------------------------------------------------------------------------
# Host-side helpers: (K,1) "same"-padded temporal conv as a banded matrix.
# ----------------------------------------------------------------------------
def banded_same(w, T):
    """w: (K, O, C) -> M: (O*T, C*T) with M[(o,t),(c,t2)] = w[t2-t+pad, o, c]."""
    K, O, C = w.shape
    pad = (K - 1) // 2
    t_out = jnp.arange(T)[:, None]
    t_in = jnp.arange(T)[None, :]
    k = t_in - t_out + pad
    valid = (k >= 0) & (k < K)
    wk = w[jnp.clip(k, 0, K - 1)]                      # (T, T, O, C)
    wk = jnp.where(valid[:, :, None, None], wk, 0.0)
    return wk.transpose(2, 0, 3, 1).reshape(O * T, C * T)


def conv_as_cols(w, bias, T):
    """(K,1) conv -> (C*T+1, O*T) column block for x_aug @ W (bias in the ones-row)."""
    m = banded_same(w, T).T                            # (C*T, O*T)
    brow = jnp.repeat(bias, T)[None, :]                # (1, O*T)  (per (o,t) row)
    return jnp.concatenate([m, brow], axis=0)


# ----------------------------------------------------------------------------
# Pallas kernels (one batch element per grid step, lanes = channel*time)
# ----------------------------------------------------------------------------
def gcn_kernel(x_ref, watt_ref, wbig_ref, abase_ref, by_ref,
               y_ref, dn_ref, r_ref, *, M, R):
    """unit_gtcn_7 core + down conv + residual conv for one batch element.

    x:     (1, V, Cin*T+1) bf16  (trailing ones lane carries conv biases)
    watt:  (Cin*T+1, 18*M) bf16  [a-side heads 0..8 | b-side heads 0..8]
    wbig:  (Cin*T+1, 5*R)  bf16  [conv_d_0 | conv_d_1 | conv_d_2 | down | residual]
    abase: (3, V, V) f32 (pre-transposed A_ch3 + A_ch4s + PA)
    by:    (1, R) f32 summed conv_d bias per (o,t) row
    outputs y/dn/r: (1, V, R) f32  (pre-BatchNorm)
    """
    x = x_ref[0]                                                       # (V, CTa) bf16

    # All 18 attention convs in one MXU pass (lane-dense (V, 18M) output).
    ab = jnp.dot(x, watt_ref[...], preferred_element_type=jnp.float32)
    # conv_d(x) for 3 subsets + down + residual 1x1 convs in one MXU pass.
    big = jnp.dot(x, wbig_ref[...], preferred_element_type=jnp.float32)  # (V, 5R)

    a16 = ab[:, :9 * M].astype(jnp.bfloat16)                           # A1-side heads
    b16 = ab[:, 9 * M:].astype(jnp.bfloat16)                           # A2-side heads
    inv = 1.0 / float(M)

    # Transposed scores s_h[v2, v1] (PyTorch softmax dim=-2 becomes the lane axis).
    scores = [
        jnp.dot(b16[:, h * M:(h + 1) * M], a16[:, h * M:(h + 1) * M].T
                if False else a16[:, h * M:(h + 1) * M].swapaxes(-1, -2)
                if False else a16[:, h * M:(h + 1) * M],
                preferred_element_type=jnp.float32)
        if False else
        lax.dot_general(b16[:, h * M:(h + 1) * M], a16[:, h * M:(h + 1) * M],
                        (((1,), (1,)), ((), ())),
                        preferred_element_type=jnp.float32) * inv
        for h in range(9)
    ]
    s = jnp.stack(scores, axis=0)                                      # (9, V, V)
    # Batched softmax over the original dim -2 (last axis of the transposed scores).
    e = jnp.exp(s - jnp.max(s, axis=-1, keepdims=True))
    p = e * pl.reciprocal(jnp.sum(e, axis=-1, keepdims=True), approx=True)

    abase_t = abase_ref[...]                                           # (3, V, V)
    acc = None
    for i in range(3):
        # A_total_i^T = Abase_i^T + sum of the 3 head softmaxes of subset i.
        a_tot_t = (abase_t[i] + p[3 * i] + p[3 * i + 1] + p[3 * i + 2]
                   ).astype(jnp.bfloat16)
        ud = big[:, i * R:(i + 1) * R].astype(jnp.bfloat16)            # conv_d_i(x)^T
        z = jnp.dot(a_tot_t, ud, preferred_element_type=jnp.float32)   # (V, R)
        acc = z if acc is None else acc + z

    y_ref[0] = acc + by_ref[...]
    dn_ref[0] = big[:, 3 * R:4 * R]
    r_ref[0] = big[:, 4 * R:5 * R]


def tcn_kernel(y_ref, dn_ref, sy_ref, sd_ref, sh_ref, wt_ref, bt_ref, t_ref):
    """g = relu(bn(y) + bn(down)); t = (9,1) tcn conv(g)   (t is pre-BatchNorm)."""
    g = jnp.maximum(y_ref[0] * sy_ref[...] + dn_ref[0] * sd_ref[...] + sh_ref[...],
                    0.0)
    t_ref[0] = (jnp.dot(g.astype(jnp.bfloat16), wt_ref[...],
                        preferred_element_type=jnp.float32) + bt_ref[...])


def out_kernel(t_ref, r_ref, st_ref, sr_ref, sh_ref, o_ref):
    """out = relu(bn(t) + bn(r)) with per-(c,t)-lane scale/shift rows."""
    o_ref[0] = jnp.maximum(
        t_ref[0] * st_ref[...] + r_ref[0] * sr_ref[...] + sh_ref[...], 0.0)


# ----------------------------------------------------------------------------
# pallas_call wrappers
# ----------------------------------------------------------------------------
def gcn_call(xt, WattT, Wbig, AbaseT, by_row, *, M, R):
    N, V, CTa = xt.shape
    flops = 2 * N * V * CTa * (18 * M + 5 * R) + 2 * N * 9 * V * V * M \
        + 2 * N * 3 * V * V * R
    bytes_acc = (xt.size * 2 + WattT.size * 2 + Wbig.size * 2 + AbaseT.size * 4
                 + by_row.size * 4 + 3 * N * V * R * 4)
    kern = functools.partial(gcn_kernel, M=M, R=R)
    return pl.pallas_call(
        kern,
        out_shape=(jax.ShapeDtypeStruct((N, V, R), jnp.float32),
                   jax.ShapeDtypeStruct((N, V, R), jnp.float32),
                   jax.ShapeDtypeStruct((N, V, R), jnp.float32)),
        grid=(N,),
        in_specs=[
            pl.BlockSpec((1, V, CTa), lambda n: (n, 0, 0)),       # x (augmented)
            pl.BlockSpec((CTa, 18 * M), lambda n: (0, 0)),        # attention weights
            pl.BlockSpec((CTa, 5 * R), lambda n: (0, 0)),         # conv_d / down / res
            pl.BlockSpec((3, V, V), lambda n: (0, 0, 0)),         # A_base^T
            pl.BlockSpec((1, R), lambda n: (0, 0)),               # conv_d bias row
        ],
        out_specs=(pl.BlockSpec((1, V, R), lambda n: (n, 0, 0)),
                   pl.BlockSpec((1, V, R), lambda n: (n, 0, 0)),
                   pl.BlockSpec((1, V, R), lambda n: (n, 0, 0))),
        compiler_params=pltpu.CompilerParams(dimension_semantics=("parallel",)),
        cost_estimate=pl.CostEstimate(flops=int(flops),
                                      transcendentals=int(N * 9 * V * V),
                                      bytes_accessed=int(bytes_acc)),
    )(xt, WattT, Wbig, AbaseT, by_row)


def tcn_call(y, dn, sy, sd, sh, WtT, bt_row):
    N, V, R = y.shape
    flops = 2 * N * V * R * R
    bytes_acc = 3 * N * V * R * 4 + WtT.size * 2 + 4 * R * 4
    return pl.pallas_call(
        tcn_kernel,
        out_shape=jax.ShapeDtypeStruct((N, V, R), jnp.float32),
        grid=(N,),
        in_specs=[
            pl.BlockSpec((1, V, R), lambda n: (n, 0, 0)),         # y
            pl.BlockSpec((1, V, R), lambda n: (n, 0, 0)),         # down
            pl.BlockSpec((1, R), lambda n: (0, 0)),               # scale(y)
            pl.BlockSpec((1, R), lambda n: (0, 0)),               # scale(down)
            pl.BlockSpec((1, R), lambda n: (0, 0)),               # shift(y)+shift(down)
            pl.BlockSpec((R, R), lambda n: (0, 0)),               # tcn banded weights^T
            pl.BlockSpec((1, R), lambda n: (0, 0)),               # tcn bias row
        ],
        out_specs=pl.BlockSpec((1, V, R), lambda n: (n, 0, 0)),
        compiler_params=pltpu.CompilerParams(dimension_semantics=("parallel",)),
        cost_estimate=pl.CostEstimate(flops=int(flops), transcendentals=0,
                                      bytes_accessed=int(bytes_acc)),
    )(y, dn, sy, sd, sh, WtT, bt_row)


def out_call(t, r, st, sr, sh):
    N, V, R = t.shape
    return pl.pallas_call(
        out_kernel,
        out_shape=jax.ShapeDtypeStruct((N, V, R), jnp.float32),
        grid=(N,),
        in_specs=[
            pl.BlockSpec((1, V, R), lambda n: (n, 0, 0)),
            pl.BlockSpec((1, V, R), lambda n: (n, 0, 0)),
            pl.BlockSpec((1, R), lambda n: (0, 0)),
            pl.BlockSpec((1, R), lambda n: (0, 0)),
            pl.BlockSpec((1, R), lambda n: (0, 0)),
        ],
        out_specs=pl.BlockSpec((1, V, R), lambda n: (n, 0, 0)),
        compiler_params=pltpu.CompilerParams(dimension_semantics=("parallel",)),
        cost_estimate=pl.CostEstimate(flops=int(4 * N * V * R), transcendentals=0,
                                      bytes_accessed=int(3 * N * V * R * 4)),
    )(t, r, st, sr, sh)


# ----------------------------------------------------------------------------
# Glue: training-mode BN batch stats -> lane-dense (1, C*T) scale/shift rows
# ----------------------------------------------------------------------------
def bn_rows(x_rows, gamma, beta, T, eps=1e-5):
    # x_rows: (N, V, C*T) with lanes ordered (c, t); biased batch var (training mode).
    N, V, R = x_rows.shape
    C = R // T
    x4 = x_rows.reshape(N, V, C, T)
    mean = jnp.mean(x4, axis=(0, 1, 3))
    var = jnp.var(x4, axis=(0, 1, 3))
    scale = gamma * lax.rsqrt(var + eps)
    shift = beta - mean * scale
    return jnp.repeat(scale, T)[None, :], jnp.repeat(shift, T)[None, :]   # (1, R)


# ----------------------------------------------------------------------------
# Parameters (deterministic synthetic init, shapes from the module __init__)
# ----------------------------------------------------------------------------
def make_raw_params(key, Cin, Cout, V, num_subset=3):
    inter = Cout // 4
    kit = iter(jax.random.split(key, 64))

    def w(K, O, C, std):
        return jax.random.normal(next(kit), (K, O, C), jnp.float32) * std

    A = jax.random.uniform(next(kit), (num_subset, V, V), jnp.float32)
    I = jnp.eye(V, dtype=jnp.float32)
    A_ch4s = jax.nn.softmax((8.0 * A**4 - 4.0 * A**2 - 4.0 * A + I) / V, axis=-2)
    A_ch3 = 4.0 * A**2 - A - 2.0 * I
    PA = jnp.full((num_subset, V, V), 1e-6, jnp.float32)

    # forward uses conv_ST11[i]/conv_ST12[i] of the interleaved list:
    # i=0 -> 1x1, i=1 -> (9,1), i=2 -> 1x1
    st_sizes = [1, 9, 1]
    heads_a, heads_b = [], []
    for i in range(num_subset):
        heads_a.append([w(1, inter, Cin, 0.2), w(9, inter, Cin, 0.1),
                        w(st_sizes[i], inter, Cin, 0.1)])
        heads_b.append([w(1, inter, Cin, 0.2), w(9, inter, Cin, 0.1),
                        w(st_sizes[i], inter, Cin, 0.1)])

    z_out = jnp.zeros((Cout,), jnp.float32)
    return {
        'Abase': A_ch3 + A_ch4s + PA,
        'heads_a': heads_a, 'heads_b': heads_b,
        'wd': [w(1, Cout, Cin, 0.2) for _ in range(num_subset)],
        'wdown': w(1, Cout, Cin, 0.2),
        'wt': w(9, Cout, Cout, 0.1),
        'wr': w(1, Cout, Cin, 0.2),
        # all conv biases are zero-initialised in the reference module
        'b_inter': jnp.zeros((inter,), jnp.float32),
        'b_d': [z_out for _ in range(num_subset)],
        'b_down': z_out, 'b_t': z_out, 'b_r': z_out,
        # BN affine: bn_init(self.bn, 1e-6); all others 1
        'bn_g': jnp.full((Cout,), 1e-6, jnp.float32), 'bn_b': z_out,
        'bnd_g': jnp.ones((Cout,), jnp.float32), 'bnd_b': z_out,
        'bnt_g': jnp.ones((Cout,), jnp.float32), 'bnt_b': z_out,
        'bnr_g': jnp.ones((Cout,), jnp.float32), 'bnr_b': z_out,
        'inter': inter, 'cout': Cout, 'num_subset': num_subset,
    }


def prepare_params(raw, T):
    """Build the folded / banded kernel operands once on the host."""
    ns, inter, Cout = raw['num_subset'], raw['inter'], raw['cout']
    bi = raw['b_inter']

    # 18 attention convs: a-side heads 0..8 then b-side heads 0..8.
    att_cols = []
    for side in ('heads_a', 'heads_b'):
        for i in range(ns):
            for wk in raw[side][i]:
                att_cols.append(conv_as_cols(wk, bi, T))
    WattT = jnp.concatenate(att_cols, axis=1).astype(jnp.bfloat16)     # (CT+1, 18M)

    # conv_d x3 (bias handled post graph-matmul) | down | residual.
    bz = jnp.zeros((Cout,), jnp.float32)
    big_cols = [conv_as_cols(raw['wd'][i], bz, T) for i in range(ns)]
    big_cols.append(conv_as_cols(raw['wdown'], raw['b_down'], T))
    big_cols.append(conv_as_cols(raw['wr'], raw['b_r'], T))
    Wbig = jnp.concatenate(big_cols, axis=1).astype(jnp.bfloat16)      # (CT+1, 5R)

    bd_sum = raw['b_d'][0]
    for i in range(1, ns):
        bd_sum = bd_sum + raw['b_d'][i]

    return {
        'WattT': WattT, 'Wbig': Wbig,
        'AbaseT': jnp.transpose(raw['Abase'], (0, 2, 1)),
        'by_row': jnp.repeat(bd_sum, T)[None, :],
        'WtT': banded_same(raw['wt'], T).T.astype(jnp.bfloat16),       # (R, R)
        'bt_row': jnp.repeat(raw['b_t'], T)[None, :],
        'bn_g': raw['bn_g'], 'bn_b': raw['bn_b'],
        'bnd_g': raw['bnd_g'], 'bnd_b': raw['bnd_b'],
        'bnt_g': raw['bnt_g'], 'bnt_b': raw['bnt_b'],
        'bnr_g': raw['bnr_g'], 'bnr_b': raw['bnr_b'],
        'cout': Cout, 'M': inter * T,
    }


# ----------------------------------------------------------------------------
# Forward pass
# ----------------------------------------------------------------------------
def forward(x, p):
    N, Cin, T, V = x.shape
    Cout = p['cout']
    R = Cout * T

    # Single lane-dense, bias-augmented input view: (N, V, Cin*T + 1) bf16.
    xt = jnp.transpose(x, (0, 3, 1, 2)).reshape(N, V, Cin * T)
    xt = jnp.concatenate([xt, jnp.ones((N, V, 1), x.dtype)], axis=-1)
    xt = xt.astype(jnp.bfloat16)

    # unit_gtcn_7 core: y = sum_i conv_d_i(x) @ A_total_i, plus down/residual convs.
    y, dn, r = gcn_call(xt, p['WattT'], p['Wbig'], p['AbaseT'], p['by_row'],
                        M=p['M'], R=R)

    sy, hy = bn_rows(y, p['bn_g'], p['bn_b'], T)
    sd, hd = bn_rows(dn, p['bnd_g'], p['bnd_b'], T)
    sr, hr = bn_rows(r, p['bnr_g'], p['bnr_b'], T)

    # g = relu(bn(y) + bn(down(x)));  t = tcn1 (9,1) conv(g)
    t = tcn_call(y, dn, sy, sd, hy + hd, p['WtT'], p['bt_row'])
    st, ht = bn_rows(t, p['bnt_g'], p['bnt_b'], T)

    out = out_call(t, r, st, sr, ht + hr)                 # relu(bn(t) + bn(r))
    return out.reshape(N, V, Cout, T).transpose(0, 2, 3, 1)


# ----------------------------------------------------------------------------
if __name__ == "__main__":
    N, Cin, Cout, T, V = 2, 4, 8, 16, 16
    key = jax.random.PRNGKey(0)
    kx, kp = jax.random.split(key)
    x = jax.random.normal(kx, (N, Cin, T, V), jnp.float32)

    raw = make_raw_params(kp, Cin, Cout, V)
    params = prepare_params(raw, T)

    fwd = jax.jit(lambda xx: forward(xx, params))
    out = fwd(x)
    jax.block_until_ready(out)
    assert out.shape == (N, Cout, T, V)
    assert bool(jnp.all(jnp.isfinite(out)))
    print("KERNEL_OK")
</pallas_src>

<mosaic_0001>
module attributes {stable_mosaic.version = 11 : i64} {
  func.func @gcn_kernel(%arg0: i32, %arg1: memref<1x16x65xbf16, #tpu.memory_space<vmem>>, %arg2: memref<65x576xbf16, #tpu.memory_space<vmem>>, %arg3: memref<65x640xbf16, #tpu.memory_space<vmem>>, %arg4: memref<3x16x16xf32, #tpu.memory_space<vmem>>, %arg5: memref<1x128xf32, #tpu.memory_space<vmem>>, %arg6: memref<1x16x128xf32, #tpu.memory_space<vmem>>, %arg7: memref<1x16x128xf32, #tpu.memory_space<vmem>>, %arg8: memref<1x16x128xf32, #tpu.memory_space<vmem>>) attributes {dimension_semantics = [#tpu.dimension_semantics<parallel>], iteration_bounds = array<i64: 2>, scalar_prefetch = 0 : i64, scratch_operands = 0 : i64, tpu.core_type = #tpu.core_type<tc>, window_params = [{transform_indices = @transform_0, window_bounds = array<i64: 1, 16, 65>}, {pipeline_mode = #tpu.pipeline_mode<synchronous>, transform_indices = @transform_1, window_bounds = array<i64: 65, 576>}, {pipeline_mode = #tpu.pipeline_mode<synchronous>, transform_indices = @transform_2, window_bounds = array<i64: 65, 640>}, {pipeline_mode = #tpu.pipeline_mode<synchronous>, transform_indices = @transform_3, window_bounds = array<i64: 3, 16, 16>}, {pipeline_mode = #tpu.pipeline_mode<synchronous>, transform_indices = @transform_4, window_bounds = array<i64: 1, 128>}, {transform_indices = @transform_5, window_bounds = array<i64: 1, 16, 128>}, {transform_indices = @transform_6, window_bounds = array<i64: 1, 16, 128>}, {transform_indices = @transform_7, window_bounds = array<i64: 1, 16, 128>}]} {
    %c0 = arith.constant 0 : index
    %c0_0 = arith.constant 0 : index
    %c0_1 = arith.constant 0 : index
    %0 = vector.load %arg1[%c0, %c0_0, %c0_1] : memref<1x16x65xbf16, #tpu.memory_space<vmem>>, vector<1x16x65xbf16>
    %1 = vector.shape_cast %0 : vector<1x16x65xbf16> to vector<16x65xbf16>
    %c0_2 = arith.constant 0 : index
    %c0_3 = arith.constant 0 : index
    %2 = vector.load %arg2[%c0_2, %c0_3] : memref<65x576xbf16, #tpu.memory_space<vmem>>, vector<65x576xbf16>
    %cst = arith.constant dense<0.000000e+00> : vector<16x576xf32>
    %3 = tpu.matmul %1, %2, %cst {dimension_numbers = #tpu.dot_dimension_numbers<[1], [0], [0], [1], [0, 0, 1, 1], [], []>} : vector<16x65xbf16>, vector<65x576xbf16>, vector<16x576xf32> -> vector<16x576xf32>
    %c0_4 = arith.constant 0 : index
    %c0_5 = arith.constant 0 : index
    %4 = vector.load %arg3[%c0_4, %c0_5] : memref<65x640xbf16, #tpu.memory_space<vmem>>, vector<65x640xbf16>
    %cst_6 = arith.constant dense<0.000000e+00> : vector<16x640xf32>
    %5 = tpu.matmul %1, %4, %cst_6 {dimension_numbers = #tpu.dot_dimension_numbers<[1], [0], [0], [1], [0, 0, 1, 1], [], []>} : vector<16x65xbf16>, vector<65x640xbf16>, vector<16x640xf32> -> vector<16x640xf32>
    %6 = vector.extract_strided_slice %3 {offsets = [0, 0], sizes = [16, 288], strides = [1, 1]} : vector<16x576xf32> to vector<16x288xf32>
    %7 = arith.truncf %6 : vector<16x288xf32> to vector<16x288xbf16>
    %8 = vector.extract_strided_slice %3 {offsets = [0, 288], sizes = [16, 288], strides = [1, 1]} : vector<16x576xf32> to vector<16x288xf32>
    %9 = arith.truncf %8 : vector<16x288xf32> to vector<16x288xbf16>
    %10 = vector.extract_strided_slice %9 {offsets = [0, 0], sizes = [16, 32], strides = [1, 1]} : vector<16x288xbf16> to vector<16x32xbf16>
    %11 = vector.extract_strided_slice %7 {offsets = [0, 0], sizes = [16, 32], strides = [1, 1]} : vector<16x288xbf16> to vector<16x32xbf16>
    %cst_7 = arith.constant dense<0.000000e+00> : vector<16x16xf32>
    %12 = tpu.matmul %10, %11, %cst_7 {dimension_numbers = #tpu.dot_dimension_numbers<[1], [1], [0], [0], [0, 0, 1, 0], [], []>} : vector<16x32xbf16>, vector<16x32xbf16>, vector<16x16xf32> -> vector<16x16xf32>
    %cst_8 = arith.constant 3.125000e-02 : f32
    %13 = vector.broadcast %cst_8 : f32 to vector<16x16xf32>
    %14 = arith.mulf %12, %13 : vector<16x16xf32>
    %15 = vector.extract_strided_slice %9 {offsets = [0, 32], sizes = [16, 32], strides = [1, 1]} : vector<16x288xbf16> to vector<16x32xbf16>
    %16 = vector.extract_strided_slice %7 {offsets = [0, 32], sizes = [16, 32], strides = [1, 1]} : vector<16x288xbf16> to vector<16x32xbf16>
    %cst_9 = arith.constant dense<0.000000e+00> : vector<16x16xf32>
    %17 = tpu.matmul %15, %16, %cst_9 {dimension_numbers = #tpu.dot_dimension_numbers<[1], [1], [0], [0], [0, 0, 1, 0], [], []>} : vector<16x32xbf16>, vector<16x32xbf16>, vector<16x16xf32> -> vector<16x16xf32>
    %cst_10 = arith.constant 3.125000e-02 : f32
    %18 = vector.broadcast %cst_10 : f32 to vector<16x16xf32>
    %19 = arith.mulf %17, %18 : vector<16x16xf32>
    %20 = vector.extract_strided_slice %9 {offsets = [0, 64], sizes = [16, 32], strides = [1, 1]} : vector<16x288xbf16> to vector<16x32xbf16>
    %21 = vector.extract_strided_slice %7 {offsets = [0, 64], sizes = [16, 32], strides = [1, 1]} : vector<16x288xbf16> to vector<16x32xbf16>
    %cst_11 = arith.constant dense<0.000000e+00> : vector<16x16xf32>
    %22 = tpu.matmul %20, %21, %cst_11 {dimension_numbers = #tpu.dot_dimension_numbers<[1], [1], [0], [0], [0, 0, 1, 0], [], []>} : vector<16x32xbf16>, vector<16x32xbf16>, vector<16x16xf32> -> vector<16x16xf32>
    %cst_12 = arith.constant 3.125000e-02 : f32
    %23 = vector.broadcast %cst_12 : f32 to vector<16x16xf32>
    %24 = arith.mulf %22, %23 : vector<16x16xf32>
    %25 = vector.extract_strided_slice %9 {offsets = [0, 96], sizes = [16, 32], strides = [1, 1]} : vector<16x288xbf16> to vector<16x32xbf16>
    %26 = vector.extract_strided_slice %7 {offsets = [0, 96], sizes = [16, 32], strides = [1, 1]} : vector<16x288xbf16> to vector<16x32xbf16>
    %cst_13 = arith.constant dense<0.000000e+00> : vector<16x16xf32>
    %27 = tpu.matmul %25, %26, %cst_13 {dimension_numbers = #tpu.dot_dimension_numbers<[1], [1], [0], [0], [0, 0, 1, 0], [], []>} : vector<16x32xbf16>, vector<16x32xbf16>, vector<16x16xf32> -> vector<16x16xf32>
    %cst_14 = arith.constant 3.125000e-02 : f32
    %28 = vector.broadcast %cst_14 : f32 to vector<16x16xf32>
    %29 = arith.mulf %27, %28 : vector<16x16xf32>
    %30 = vector.extract_strided_slice %9 {offsets = [0, 128], sizes = [16, 32], strides = [1, 1]} : vector<16x288xbf16> to vector<16x32xbf16>
    %31 = vector.extract_strided_slice %7 {offsets = [0, 128], sizes = [16, 32], strides = [1, 1]} : vector<16x288xbf16> to vector<16x32xbf16>
    %cst_15 = arith.constant dense<0.000000e+00> : vector<16x16xf32>
    %32 = tpu.matmul %30, %31, %cst_15 {dimension_numbers = #tpu.dot_dimension_numbers<[1], [1], [0], [0], [0, 0, 1, 0], [], []>} : vector<16x32xbf16>, vector<16x32xbf16>, vector<16x16xf32> -> vector<16x16xf32>
    %cst_16 = arith.constant 3.125000e-02 : f32
    %33 = vector.broadcast %cst_16 : f32 to vector<16x16xf32>
    %34 = arith.mulf %32, %33 : vector<16x16xf32>
    %35 = vector.extract_strided_slice %9 {offsets = [0, 160], sizes = [16, 32], strides = [1, 1]} : vector<16x288xbf16> to vector<16x32xbf16>
    %36 = vector.extract_strided_slice %7 {offsets = [0, 160], sizes = [16, 32], strides = [1, 1]} : vector<16x288xbf16> to vector<16x32xbf16>
    %cst_17 = arith.constant dense<0.000000e+00> : vector<16x16xf32>
    %37 = tpu.matmul %35, %36, %cst_17 {dimension_numbers = #tpu.dot_dimension_numbers<[1], [1], [0], [0], [0, 0, 1, 0], [], []>} : vector<16x32xbf16>, vector<16x32xbf16>, vector<16x16xf32> -> vector<16x16xf32>
    %cst_18 = arith.constant 3.125000e-02 : f32
    %38 = vector.broadcast %cst_18 : f32 to vector<16x16xf32>
    %39 = arith.mulf %37, %38 : vector<16x16xf32>
    %40 = vector.extract_strided_slice %9 {offsets = [0, 192], sizes = [16, 32], strides = [1, 1]} : vector<16x288xbf16> to vector<16x32xbf16>
    %41 = vector.extract_strided_slice %7 {offsets = [0, 192], sizes = [16, 32], strides = [1, 1]} : vector<16x288xbf16> to vector<16x32xbf16>
    %cst_19 = arith.constant dense<0.000000e+00> : vector<16x16xf32>
    %42 = tpu.matmul %40, %41, %cst_19 {dimension_numbers = #tpu.dot_dimension_numbers<[1], [1], [0], [0], [0, 0, 1, 0], [], []>} : vector<16x32xbf16>, vector<16x32xbf16>, vector<16x16xf32> -> vector<16x16xf32>
    %cst_20 = arith.constant 3.125000e-02 : f32
    %43 = vector.broadcast %cst_20 : f32 to vector<16x16xf32>
    %44 = arith.mulf %42, %43 : vector<16x16xf32>
    %45 = vector.extract_strided_slice %9 {offsets = [0, 224], sizes = [16, 32], strides = [1, 1]} : vector<16x288xbf16> to vector<16x32xbf16>
    %46 = vector.extract_strided_slice %7 {offsets = [0, 224], sizes = [16, 32], strides = [1, 1]} : vector<16x288xbf16> to vector<16x32xbf16>
    %cst_21 = arith.constant dense<0.000000e+00> : vector<16x16xf32>
    %47 = tpu.matmul %45, %46, %cst_21 {dimension_numbers = #tpu.dot_dimension_numbers<[1], [1], [0], [0], [0, 0, 1, 0], [], []>} : vector<16x32xbf16>, vector<16x32xbf16>, vector<16x16xf32> -> vector<16x16xf32>
    %cst_22 = arith.constant 3.125000e-02 : f32
    %48 = vector.broadcast %cst_22 : f32 to vector<16x16xf32>
    %49 = arith.mulf %47, %48 : vector<16x16xf32>
    %50 = vector.extract_strided_slice %9 {offsets = [0, 256], sizes = [16, 32], strides = [1, 1]} : vector<16x288xbf16> to vector<16x32xbf16>
    %51 = vector.extract_strided_slice %7 {offsets = [0, 256], sizes = [16, 32], strides = [1, 1]} : vector<16x288xbf16> to vector<16x32xbf16>
    %cst_23 = arith.constant dense<0.000000e+00> : vector<16x16xf32>
    %52 = tpu.matmul %50, %51, %cst_23 {dimension_numbers = #tpu.dot_dimension_numbers<[1], [1], [0], [0], [0, 0, 1, 0], [], []>} : vector<16x32xbf16>, vector<16x32xbf16>, vector<16x16xf32> -> vector<16x16xf32>
    %cst_24 = arith.constant 3.125000e-02 : f32
    %53 = vector.broadcast %cst_24 : f32 to vector<16x16xf32>
    %54 = arith.mulf %52, %53 : vector<16x16xf32>
    %55 = vector.shape_cast %14 : vector<16x16xf32> to vector<1x16x16xf32>
    %56 = vector.shape_cast %19 : vector<16x16xf32> to vector<1x16x16xf32>
    %57 = vector.shape_cast %24 : vector<16x16xf32> to vector<1x16x16xf32>
    %58 = vector.shape_cast %29 : vector<16x16xf32> to vector<1x16x16xf32>
    %59 = vector.shape_cast %34 : vector<16x16xf32> to vector<1x16x16xf32>
    %60 = vector.shape_cast %39 : vector<16x16xf32> to vector<1x16x16xf32>
    %61 = vector.shape_cast %44 : vector<16x16xf32> to vector<1x16x16xf32>
    %62 = vector.shape_cast %49 : vector<16x16xf32> to vector<1x16x16xf32>
    %63 = vector.shape_cast %54 : vector<16x16xf32> to vector<1x16x16xf32>
    %64 = tpu.concatenate %55, %56, %57, %58, %59, %60, %61, %62, %63 in 0 : vector<1x16x16xf32>, vector<1x16x16xf32>, vector<1x16x16xf32>, vector<1x16x16xf32>, vector<1x16x16xf32>, vector<1x16x16xf32>, vector<1x16x16xf32>, vector<1x16x16xf32>, vector<1x16x16xf32> -> vector<9x16x16xf32>
    %cst_25 = arith.constant dense<0xFF800000> : vector<9x16xf32>
    %65 = vector.multi_reduction <maximumf>, %64, %cst_25 [2] : vector<9x16x16xf32> to vector<9x16xf32>
    %66 = vector.shape_cast %65 : vector<9x16xf32> to vector<9x16x1xf32>
    %67 = vector.broadcast %66 : vector<9x16x1xf32> to vector<9x16x16xf32>
    %68 = arith.subf %64, %67 : vector<9x16x16xf32>
    %69 = math.exp %68 : vector<9x16x16xf32>
    %cst_26 = arith.constant dense<0.000000e+00> : vector<9x16xf32>
    %70 = vector.multi_reduction <add>, %69, %cst_26 [2] : vector<9x16x16xf32> to vector<9x16xf32>
    %71 = vector.shape_cast %70 : vector<9x16xf32> to vector<9x16x1xf32>
    %72 = tpu.reciprocal %71 {approx = true} : vector<9x16x1xf32> -> vector<9x16x1xf32>
    %73 = vector.broadcast %72 : vector<9x16x1xf32> to vector<9x16x16xf32>
    %74 = arith.mulf %69, %73 : vector<9x16x16xf32>
    %c0_27 = arith.constant 0 : index
    %c0_28 = arith.constant 0 : index
    %c0_29 = arith.constant 0 : index
    %75 = vector.load %arg4[%c0_27, %c0_28, %c0_29] : memref<3x16x16xf32, #tpu.memory_space<vmem>>, vector<3x16x16xf32>
    %76 = vector.extract_strided_slice %75 {offsets = [0, 0, 0], sizes = [1, 16, 16], strides = [1, 1, 1]} : vector<3x16x16xf32> to vector<1x16x16xf32>
    %77 = vector.shape_cast %76 : vector<1x16x16xf32> to vector<16x16xf32>
    %78 = vector.extract_strided_slice %74 {offsets = [0, 0, 0], sizes = [1, 16, 16], strides = [1, 1, 1]} : vector<9x16x16xf32> to vector<1x16x16xf32>
    %79 = vector.shape_cast %78 : vector<1x16x16xf32> to vector<16x16xf32>
    %80 = arith.addf %77, %79 : vector<16x16xf32>
    %81 = vector.extract_strided_slice %74 {offsets = [1, 0, 0], sizes = [1, 16, 16], strides = [1, 1, 1]} : vector<9x16x16xf32> to vector<1x16x16xf32>
    %82 = vector.shape_cast %81 : vector<1x16x16xf32> to vector<16x16xf32>
    %83 = arith.addf %80, %82 : vector<16x16xf32>
    %84 = vector.extract_strided_slice %74 {offsets = [2, 0, 0], sizes = [1, 16, 16], strides = [1, 1, 1]} : vector<9x16x16xf32> to vector<1x16x16xf32>
    %85 = vector.shape_cast %84 : vector<1x16x16xf32> to vector<16x16xf32>
    %86 = arith.addf %83, %85 : vector<16x16xf32>
    %87 = arith.truncf %86 : vector<16x16xf32> to vector<16x16xbf16>
    %88 = vector.extract_strided_slice %5 {offsets = [0, 0], sizes = [16, 128], strides = [1, 1]} : vector<16x640xf32> to vector<16x128xf32>
    %89 = arith.truncf %88 : vector<16x128xf32> to vector<16x128xbf16>
    %cst_30 = arith.constant dense<0.000000e+00> : vector<16x128xf32>
    %90 = tpu.matmul %87, %89, %cst_30 {dimension_numbers = #tpu.dot_dimension_numbers<[1], [0], [0], [1], [0, 0, 1, 1], [], []>} : vector<16x16xbf16>, vector<16x128xbf16>, vector<16x128xf32> -> vector<16x128xf32>
    %91 = vector.extract_strided_slice %75 {offsets = [1, 0, 0], sizes = [1, 16, 16], strides = [1, 1, 1]} : vector<3x16x16xf32> to vector<1x16x16xf32>
    %92 = vector.shape_cast %91 : vector<1x16x16xf32> to vector<16x16xf32>
    %93 = vector.extract_strided_slice %74 {offsets = [3, 0, 0], sizes = [1, 16, 16], strides = [1, 1, 1]} : vector<9x16x16xf32> to vector<1x16x16xf32>
    %94 = vector.shape_cast %93 : vector<1x16x16xf32> to vector<16x16xf32>
    %95 = arith.addf %92, %94 : vector<16x16xf32>
    %96 = vector.extract_strided_slice %74 {offsets = [4, 0, 0], sizes = [1, 16, 16], strides = [1, 1, 1]} : vector<9x16x16xf32> to vector<1x16x16xf32>
    %97 = vector.shape_cast %96 : vector<1x16x16xf32> to vector<16x16xf32>
    %98 = arith.addf %95, %97 : vector<16x16xf32>
    %99 = vector.extract_strided_slice %74 {offsets = [5, 0, 0], sizes = [1, 16, 16], strides = [1, 1, 1]} : vector<9x16x16xf32> to vector<1x16x16xf32>
    %100 = vector.shape_cast %99 : vector<1x16x16xf32> to vector<16x16xf32>
    %101 = arith.addf %98, %100 : vector<16x16xf32>
    %102 = arith.truncf %101 : vector<16x16xf32> to vector<16x16xbf16>
    %103 = vector.extract_strided_slice %5 {offsets = [0, 128], sizes = [16, 128], strides = [1, 1]} : vector<16x640xf32> to vector<16x128xf32>
    %104 = arith.truncf %103 : vector<16x128xf32> to vector<16x128xbf16>
    %cst_31 = arith.constant dense<0.000000e+00> : vector<16x128xf32>
    %105 = tpu.matmul %102, %104, %cst_31 {dimension_numbers = #tpu.dot_dimension_numbers<[1], [0], [0], [1], [0, 0, 1, 1], [], []>} : vector<16x16xbf16>, vector<16x128xbf16>, vector<16x128xf32> -> vector<16x128xf32>
    %106 = arith.addf %90, %105 : vector<16x128xf32>
    %107 = vector.extract_strided_slice %75 {offsets = [2, 0, 0], sizes = [1, 16, 16], strides = [1, 1, 1]} : vector<3x16x16xf32> to vector<1x16x16xf32>
    %108 = vector.shape_cast %107 : vector<1x16x16xf32> to vector<16x16xf32>
    %109 = vector.extract_strided_slice %74 {offsets = [6, 0, 0], sizes = [1, 16, 16], strides = [1, 1, 1]} : vector<9x16x16xf32> to vector<1x16x16xf32>
    %110 = vector.shape_cast %109 : vector<1x16x16xf32> to vector<16x16xf32>
    %111 = arith.addf %108, %110 : vector<16x16xf32>
    %112 = vector.extract_strided_slice %74 {offsets = [7, 0, 0], sizes = [1, 16, 16], strides = [1, 1, 1]} : vector<9x16x16xf32> to vector<1x16x16xf32>
    %113 = vector.shape_cast %112 : vector<1x16x16xf32> to vector<16x16xf32>
    %114 = arith.addf %111, %113 : vector<16x16xf32>
    %115 = vector.extract_strided_slice %74 {offsets = [8, 0, 0], sizes = [1, 16, 16], strides = [1, 1, 1]} : vector<9x16x16xf32> to vector<1x16x16xf32>
    %116 = vector.shape_cast %115 : vector<1x16x16xf32> to vector<16x16xf32>
    %117 = arith.addf %114, %116 : vector<16x16xf32>
    %118 = arith.truncf %117 : vector<16x16xf32> to vector<16x16xbf16>
    %119 = vector.extract_strided_slice %5 {offsets = [0, 256], sizes = [16, 128], strides = [1, 1]} : vector<16x640xf32> to vector<16x128xf32>
    %120 = arith.truncf %119 : vector<16x128xf32> to vector<16x128xbf16>
    %cst_32 = arith.constant dense<0.000000e+00> : vector<16x128xf32>
    %121 = tpu.matmul %118, %120, %cst_32 {dimension_numbers = #tpu.dot_dimension_numbers<[1], [0], [0], [1], [0, 0, 1, 1], [], []>} : vector<16x16xbf16>, vector<16x128xbf16>, vector<16x128xf32> -> vector<16x128xf32>
    %122 = arith.addf %106, %121 : vector<16x128xf32>
    %c0_33 = arith.constant 0 : index
    %c0_34 = arith.constant 0 : index
    %123 = vector.load %arg5[%c0_33, %c0_34] : memref<1x128xf32, #tpu.memory_space<vmem>>, vector<1x128xf32>
    %124 = vector.broadcast %123 : vector<1x128xf32> to vector<16x128xf32>
    %125 = arith.addf %122, %124 : vector<16x128xf32>
    %c0_35 = arith.constant 0 : index
    %c0_36 = arith.constant 0 : index
    %c0_37 = arith.constant 0 : index
    %126 = vector.load %arg6[%c0_35, %c0_36, %c0_37] : memref<1x16x128xf32, #tpu.memory_space<vmem>>, vector<1x16x128xf32>
    %127 = vector.shape_cast %126 : vector<1x16x128xf32> to vector<16x128xf32>
    %128 = vector.shape_cast %125 : vector<16x128xf32> to vector<1x16x128xf32>
    tpu.vector_store %arg6[%c0_35, %c0_36, %c0_37], %128 {strides = array<i32>} : memref<1x16x128xf32, #tpu.memory_space<vmem>>, vector<1x16x128xf32>,
    %129 = vector.extract_strided_slice %5 {offsets = [0, 384], sizes = [16, 128], strides = [1, 1]} : vector<16x640xf32> to vector<16x128xf32>
    %c0_38 = arith.constant 0 : index
    %c0_39 = arith.constant 0 : index
    %c0_40 = arith.constant 0 : index
    %130 = vector.load %arg7[%c0_38, %c0_39, %c0_40] : memref<1x16x128xf32, #tpu.memory_space<vmem>>, vector<1x16x128xf32>
    %131 = vector.shape_cast %130 : vector<1x16x128xf32> to vector<16x128xf32>
    %132 = vector.shape_cast %129 : vector<16x128xf32> to vector<1x16x128xf32>
    tpu.vector_store %arg7[%c0_38, %c0_39, %c0_40], %132 {strides = array<i32>} : memref<1x16x128xf32, #tpu.memory_space<vmem>>, vector<1x16x128xf32>,
    %133 = vector.extract_strided_slice %5 {offsets = [0, 512], sizes = [16, 128], strides = [1, 1]} : vector<16x640xf32> to vector<16x128xf32>
    %c0_41 = arith.constant 0 : index
    %c0_42 = arith.constant 0 : index
    %c0_43 = arith.constant 0 : index
    %134 = vector.load %arg8[%c0_41, %c0_42, %c0_43] : memref<1x16x128xf32, #tpu.memory_space<vmem>>, vector<1x16x128xf32>
    %135 = vector.shape_cast %134 : vector<1x16x128xf32> to vector<16x128xf32>
    %136 = vector.shape_cast %133 : vector<16x128xf32> to vector<1x16x128xf32>
    tpu.vector_store %arg8[%c0_41, %c0_42, %c0_43], %136 {strides = array<i32>} : memref<1x16x128xf32, #tpu.memory_space<vmem>>, vector<1x16x128xf32>,
    return
  }
  func.func @transform_0(%arg0: i32) -> (i32, i32, i32) {
    %c0_i32 = arith.constant 0 : i32
    %c0_i32_0 = arith.constant 0 : i32
    %c0_i32_1 = arith.constant 0 : i32
    return %arg0, %c0_i32, %c0_i32_0 : i32, i32, i32
  }
  func.func @transform_1(%arg0: i32) -> (i32, i32) {
    %c0_i32 = arith.constant 0 : i32
    %c0_i32_0 = arith.constant 0 : i32
    %c0_i32_1 = arith.constant 0 : i32
    return %c0_i32, %c0_i32_0 : i32, i32
  }
  func.func @transform_2(%arg0: i32) -> (i32, i32) {
    %c0_i32 = arith.constant 0 : i32
    %c0_i32_0 = arith.constant 0 : i32
    %c0_i32_1 = arith.constant 0 : i32
    return %c0_i32, %c0_i32_0 : i32, i32
  }
  func.func @transform_3(%arg0: i32) -> (i32, i32, i32) {
    %c0_i32 = arith.constant 0 : i32
    %c0_i32_0 = arith.constant 0 : i32
    %c0_i32_1 = arith.constant 0 : i32
    %c0_i32_2 = arith.constant 0 : i32
    return %c0_i32, %c0_i32_0, %c0_i32_1 : i32, i32, i32
  }
  func.func @transform_4(%arg0: i32) -> (i32, i32) {
    %c0_i32 = arith.constant 0 : i32
    %c0_i32_0 = arith.constant 0 : i32
    %c0_i32_1 = arith.constant 0 : i32
    return %c0_i32, %c0_i32_0 : i32, i32
  }
  func.func @transform_5(%arg0: i32) -> (i32, i32, i32) {
    %c0_i32 = arith.constant 0 : i32
    %c0_i32_0 = arith.constant 0 : i32
    %c0_i32_1 = arith.constant 0 : i32
    return %arg0, %c0_i32, %c0_i32_0 : i32, i32, i32
  }
  func.func @transform_6(%arg0: i32) -> (i32, i32, i32) {
    %c0_i32 = arith.constant 0 : i32
    %c0_i32_0 = arith.constant 0 : i32
    %c0_i32_1 = arith.constant 0 : i32
    return %arg0, %c0_i32, %c0_i32_0 : i32, i32, i32
  }
  func.func @transform_7(%arg0: i32) -> (i32, i32, i32) {
    %c0_i32 = arith.constant 0 : i32
    %c0_i32_0 = arith.constant 0 : i32
    %c0_i32_1 = arith.constant 0 : i32
    return %arg0, %c0_i32, %c0_i32_0 : i32, i32, i32
  }
}

module attributes {stable_mosaic.version = 11 : i64} {
  func.func @tcn_kernel(%arg0: i32, %arg1: memref<1x16x128xf32, #tpu.memory_space<vmem>>, %arg2: memref<1x16x128xf32, #tpu.memory_space<vmem>>, %arg3: memref<1x128xf32, #tpu.memory_space<vmem>>, %arg4: memref<1x128xf32, #tpu.memory_space<vmem>>, %arg5: memref<1x128xf32, #tpu.memory_space<vmem>>, %arg6: memref<128x128xbf16, #tpu.memory_space<vmem>>, %arg7: memref<1x128xf32, #tpu.memory_space<vmem>>, %arg8: memref<1x16x128xf32, #tpu.memory_space<vmem>>) attributes {dimension_semantics = [#tpu.dimension_semantics<parallel>], iteration_bounds = array<i64: 2>, scalar_prefetch = 0 : i64, scratch_operands = 0 : i64, tpu.core_type = #tpu.core_type<tc>, window_params = [{transform_indices = @transform_0, window_bounds = array<i64: 1, 16, 128>}, {transform_indices = @transform_1, window_bounds = array<i64: 1, 16, 128>}, {pipeline_mode = #tpu.pipeline_mode<synchronous>, transform_indices = @transform_2, window_bounds = array<i64: 1, 128>}, {pipeline_mode = #tpu.pipeline_mode<synchronous>, transform_indices = @transform_3, window_bounds = array<i64: 1, 128>}, {pipeline_mode = #tpu.pipeline_mode<synchronous>, transform_indices = @transform_4, window_bounds = array<i64: 1, 128>}, {pipeline_mode = #tpu.pipeline_mode<synchronous>, transform_indices = @transform_5, window_bounds = array<i64: 128, 128>}, {pipeline_mode = #tpu.pipeline_mode<synchronous>, transform_indices = @transform_6, window_bounds = array<i64: 1, 128>}, {transform_indices = @transform_7, window_bounds = array<i64: 1, 16, 128>}]} {
    %c0 = arith.constant 0 : index
    %c0_0 = arith.constant 0 : index
    %c0_1 = arith.constant 0 : index
    %0 = vector.load %arg1[%c0, %c0_0, %c0_1] : memref<1x16x128xf32, #tpu.memory_space<vmem>>, vector<1x16x128xf32>
    %1 = vector.shape_cast %0 : vector<1x16x128xf32> to vector<16x128xf32>
    %c0_2 = arith.constant 0 : index
    %c0_3 = arith.constant 0 : index
    %2 = vector.load %arg3[%c0_2, %c0_3] : memref<1x128xf32, #tpu.memory_space<vmem>>, vector<1x128xf32>
    %3 = vector.broadcast %2 : vector<1x128xf32> to vector<16x128xf32>
    %4 = arith.mulf %1, %3 : vector<16x128xf32>
    %c0_4 = arith.constant 0 : index
    %c0_5 = arith.constant 0 : index
    %c0_6 = arith.constant 0 : index
    %5 = vector.load %arg2[%c0_4, %c0_5, %c0_6] : memref<1x16x128xf32, #tpu.memory_space<vmem>>, vector<1x16x128xf32>
    %6 = vector.shape_cast %5 : vector<1x16x128xf32> to vector<16x128xf32>
    %c0_7 = arith.constant 0 : index
    %c0_8 = arith.constant 0 : index
    %7 = vector.load %arg4[%c0_7, %c0_8] : memref<1x128xf32, #tpu.memory_space<vmem>>, vector<1x128xf32>
    %8 = vector.broadcast %7 : vector<1x128xf32> to vector<16x128xf32>
    %9 = arith.mulf %6, %8 : vector<16x128xf32>
    %10 = arith.addf %4, %9 : vector<16x128xf32>
    %c0_9 = arith.constant 0 : index
    %c0_10 = arith.constant 0 : index
    %11 = vector.load %arg5[%c0_9, %c0_10] : memref<1x128xf32, #tpu.memory_space<vmem>>, vector<1x128xf32>
    %12 = vector.broadcast %11 : vector<1x128xf32> to vector<16x128xf32>
    %13 = arith.addf %10, %12 : vector<16x128xf32>
    %cst = arith.constant 0.000000e+00 : f32
    %14 = vector.broadcast %cst : f32 to vector<16x128xf32>
    %15 = arith.maximumf %13, %14 : vector<16x128xf32>
    %16 = arith.truncf %15 : vector<16x128xf32> to vector<16x128xbf16>
    %c0_11 = arith.constant 0 : index
    %c0_12 = arith.constant 0 : index
    %17 = vector.load %arg6[%c0_11, %c0_12] : memref<128x128xbf16, #tpu.memory_space<vmem>>, vector<128x128xbf16>
    %cst_13 = arith.constant dense<0.000000e+00> : vector<16x128xf32>
    %18 = tpu.matmul %16, %17, %cst_13 {dimension_numbers = #tpu.dot_dimension_numbers<[1], [0], [0], [1], [0, 0, 1, 1], [], []>} : vector<16x128xbf16>, vector<128x128xbf16>, vector<16x128xf32> -> vector<16x128xf32>
    %c0_14 = arith.constant 0 : index
    %c0_15 = arith.constant 0 : index
    %19 = vector.load %arg7[%c0_14, %c0_15] : memref<1x128xf32, #tpu.memory_space<vmem>>, vector<1x128xf32>
    %20 = vector.broadcast %19 : vector<1x128xf32> to vector<16x128xf32>
    %21 = arith.addf %18, %20 : vector<16x128xf32>
    %c0_16 = arith.constant 0 : index
    %c0_17 = arith.constant 0 : index
    %c0_18 = arith.constant 0 : index
    %22 = vector.load %arg8[%c0_16, %c0_17, %c0_18] : memref<1x16x128xf32, #tpu.memory_space<vmem>>, vector<1x16x128xf32>
    %23 = vector.shape_cast %22 : vector<1x16x128xf32> to vector<16x128xf32>
    %24 = vector.shape_cast %21 : vector<16x128xf32> to vector<1x16x128xf32>
    tpu.vector_store %arg8[%c0_16, %c0_17, %c0_18], %24 {strides = array<i32>} : memref<1x16x128xf32, #tpu.memory_space<vmem>>, vector<1x16x128xf32>,
    return
  }
  func.func @transform_0(%arg0: i32) -> (i32, i32, i32) {
    %c0_i32 = arith.constant 0 : i32
    %c0_i32_0 = arith.constant 0 : i32
    %c0_i32_1 = arith.constant 0 : i32
    return %arg0, %c0_i32, %c0_i32_0 : i32, i32, i32
  }
  func.func @transform_1(%arg0: i32) -> (i32, i32, i32) {
    %c0_i32 = arith.constant 0 : i32
    %c0_i32_0 = arith.constant 0 : i32
    %c0_i32_1 = arith.constant 0 : i32
    return %arg0, %c0_i32, %c0_i32_0 : i32, i32, i32
  }
  func.func @transform_2(%arg0: i32) -> (i32, i32) {
    %c0_i32 = arith.constant 0 : i32
    %c0_i32_0 = arith.constant 0 : i32
    %c0_i32_1 = arith.constant 0 : i32
    return %c0_i32, %c0_i32_0 : i32, i32
  }
  func.func @transform_3(%arg0: i32) -> (i32, i32) {
    %c0_i32 = arith.constant 0 : i32
    %c0_i32_0 = arith.constant 0 : i32
    %c0_i32_1 = arith.constant 0 : i32
    return %c0_i32, %c0_i32_0 : i32, i32
  }
  func.func @transform_4(%arg0: i32) -> (i32, i32) {
    %c0_i32 = arith.constant 0 : i32
    %c0_i32_0 = arith.constant 0 : i32
    %c0_i32_1 = arith.constant 0 : i32
    return %c0_i32, %c0_i32_0 : i32, i32
  }
  func.func @transform_5(%arg0: i32) -> (i32, i32) {
    %c0_i32 = arith.constant 0 : i32
    %c0_i32_0 = arith.constant 0 : i32
    %c0_i32_1 = arith.constant 0 : i32
    return %c0_i32, %c0_i32_0 : i32, i32
  }
  func.func @transform_6(%arg0: i32) -> (i32, i32) {
    %c0_i32 = arith.constant 0 : i32
    %c0_i32_0 = arith.constant 0 : i32
    %c0_i32_1 = arith.constant 0 : i32
    return %c0_i32, %c0_i32_0 : i32, i32
  }
  func.func @transform_7(%arg0: i32) -> (i32, i32, i32) {
    %c0_i32 = arith.constant 0 : i32
    %c0_i32_0 = arith.constant 0 : i32
    %c0_i32_1 = arith.constant 0 : i32
    return %arg0, %c0_i32, %c0_i32_0 : i32, i32, i32
  }
}

module attributes {stable_mosaic.version = 11 : i64} {
  func.func @out_kernel(%arg0: i32, %arg1: memref<1x16x128xf32, #tpu.memory_space<vmem>>, %arg2: memref<1x16x128xf32, #tpu.memory_space<vmem>>, %arg3: memref<1x128xf32, #tpu.memory_space<vmem>>, %arg4: memref<1x128xf32, #tpu.memory_space<vmem>>, %arg5: memref<1x128xf32, #tpu.memory_space<vmem>>, %arg6: memref<1x16x128xf32, #tpu.memory_space<vmem>>) attributes {dimension_semantics = [#tpu.dimension_semantics<parallel>], iteration_bounds = array<i64: 2>, scalar_prefetch = 0 : i64, scratch_operands = 0 : i64, tpu.core_type = #tpu.core_type<tc>, window_params = [{transform_indices = @transform_0, window_bounds = array<i64: 1, 16, 128>}, {transform_indices = @transform_1, window_bounds = array<i64: 1, 16, 128>}, {pipeline_mode = #tpu.pipeline_mode<synchronous>, transform_indices = @transform_2, window_bounds = array<i64: 1, 128>}, {pipeline_mode = #tpu.pipeline_mode<synchronous>, transform_indices = @transform_3, window_bounds = array<i64: 1, 128>}, {pipeline_mode = #tpu.pipeline_mode<synchronous>, transform_indices = @transform_4, window_bounds = array<i64: 1, 128>}, {transform_indices = @transform_5, window_bounds = array<i64: 1, 16, 128>}]} {
    %c0 = arith.constant 0 : index
    %c0_0 = arith.constant 0 : index
    %c0_1 = arith.constant 0 : index
    %0 = vector.load %arg1[%c0, %c0_0, %c0_1] : memref<1x16x128xf32, #tpu.memory_space<vmem>>, vector<1x16x128xf32>
    %1 = vector.shape_cast %0 : vector<1x16x128xf32> to vector<16x128xf32>
    %c0_2 = arith.constant 0 : index
    %c0_3 = arith.constant 0 : index
    %2 = vector.load %arg3[%c0_2, %c0_3] : memref<1x128xf32, #tpu.memory_space<vmem>>, vector<1x128xf32>
    %3 = vector.broadcast %2 : vector<1x128xf32> to vector<16x128xf32>
    %4 = arith.mulf %1, %3 : vector<16x128xf32>
    %c0_4 = arith.constant 0 : index
    %c0_5 = arith.constant 0 : index
    %c0_6 = arith.constant 0 : index
    %5 = vector.load %arg2[%c0_4, %c0_5, %c0_6] : memref<1x16x128xf32, #tpu.memory_space<vmem>>, vector<1x16x128xf32>
    %6 = vector.shape_cast %5 : vector<1x16x128xf32> to vector<16x128xf32>
    %c0_7 = arith.constant 0 : index
    %c0_8 = arith.constant 0 : index
    %7 = vector.load %arg4[%c0_7, %c0_8] : memref<1x128xf32, #tpu.memory_space<vmem>>, vector<1x128xf32>
    %8 = vector.broadcast %7 : vector<1x128xf32> to vector<16x128xf32>
    %9 = arith.mulf %6, %8 : vector<16x128xf32>
    %10 = arith.addf %4, %9 : vector<16x128xf32>
    %c0_9 = arith.constant 0 : index
    %c0_10 = arith.constant 0 : index
    %11 = vector.load %arg5[%c0_9, %c0_10] : memref<1x128xf32, #tpu.memory_space<vmem>>, vector<1x128xf32>
    %12 = vector.broadcast %11 : vector<1x128xf32> to vector<16x128xf32>
    %13 = arith.addf %10, %12 : vector<16x128xf32>
    %cst = arith.constant 0.000000e+00 : f32
    %14 = vector.broadcast %cst : f32 to vector<16x128xf32>
    %15 = arith.maximumf %13, %14 : vector<16x128xf32>
    %c0_11 = arith.constant 0 : index
    %c0_12 = arith.constant 0 : index
    %c0_13 = arith.constant 0 : index
    %16 = vector.load %arg6[%c0_11, %c0_12, %c0_13] : memref<1x16x128xf32, #tpu.memory_space<vmem>>, vector<1x16x128xf32>
    %17 = vector.shape_cast %16 : vector<1x16x128xf32> to vector<16x128xf32>
    %18 = vector.shape_cast %15 : vector<16x128xf32> to vector<1x16x128xf32>
    tpu.vector_store %arg6[%c0_11, %c0_12, %c0_13], %18 {strides = array<i32>} : memref<1x16x128xf32, #tpu.memory_space<vmem>>, vector<1x16x128xf32>,
    return
  }
  func.func @transform_0(%arg0: i32) -> (i32, i32, i32) {
    %c0_i32 = arith.constant 0 : i32
    %c0_i32_0 = arith.constant 0 : i32
    %c0_i32_1 = arith.constant 0 : i32
    return %arg0, %c0_i32, %c0_i32_0 : i32, i32, i32
  }
  func.func @transform_1(%arg0: i32) -> (i32, i32, i32) {
    %c0_i32 = arith.constant 0 : i32
    %c0_i32_0 = arith.constant 0 : i32
    %c0_i32_1 = arith.constant 0 : i32
    return %arg0, %c0_i32, %c0_i32_0 : i32, i32, i32
  }
  func.func @transform_2(%arg0: i32) -> (i32, i32) {
    %c0_i32 = arith.constant 0 : i32
    %c0_i32_0 = arith.constant 0 : i32
    %c0_i32_1 = arith.constant 0 : i32
    return %c0_i32, %c0_i32_0 : i32, i32
  }
  func.func @transform_3(%arg0: i32) -> (i32, i32) {
    %c0_i32 = arith.constant 0 : i32
    %c0_i32_0 = arith.constant 0 : i32
    %c0_i32_1 = arith.constant 0 : i32
    return %c0_i32, %c0_i32_0 : i32, i32
  }
  func.func @transform_4(%arg0: i32) -> (i32, i32) {
    %c0_i32 = arith.constant 0 : i32
    %c0_i32_0 = arith.constant 0 : i32
    %c0_i32_1 = arith.constant 0 : i32
    return %c0_i32, %c0_i32_0 : i32, i32
  }
  func.func @transform_5(%arg0: i32) -> (i32, i32, i32) {
    %c0_i32 = arith.constant 0 : i32
    %c0_i32_0 = arith.constant 0 : i32
    %c0_i32_1 = arith.constant 0 : i32
    return %arg0, %c0_i32, %c0_i32_0 : i32, i32, i32
  }
}

</mosaic_0001>

<bundles_post_ra>
// kernel: _lambda_.5
= control target key start
LH: loop header
LB: loop body
LE: loop exit
PB: predicated region body
PF: predicated region fallthrough
CT: control target
= control target key end

     0   :  { %s405_s18 = smov 0   ;;  %s434_s0 = inlined_call_operand.vmem [shape: f32[2,16,128], index: 0, kind: input, shape index: {}]   ;;  %s435_s1 = inlined_call_operand.vmem [shape: f32[2,16,128], index: 1, kind: input, shape index: {}]   ;;  %s436_s2 = inlined_call_operand.vmem [shape: f32[1,128], index: 2, kind: input, shape index: {}]   ;;  %s437_s3 = inlined_call_operand.vmem [shape: f32[1,128], index: 3, kind: input, shape index: {}]   ;;  %s438_s4 = inlined_call_operand.vmem [shape: f32[1,128], index: 4, kind: input, shape index: {}]   ;;  %s439_s5 = inlined_call_operand.vmem [shape: f32[2,16,128], index: 5, kind: output, shape index: {}]  }
   0x1 LB: > { %s340_s19 = sadd.s32 4294967295, %s373_s18   ;;  %p344_p0 = scmp.ge.s32.totalorder %s373_s18, 1  ;;  %s373_s18 = sphi %s405_s18, %s15_s18  }
   0x2   : > { %p197_p1 = scmp.lt.s32.totalorder %s373_s18, 3 }
   0x4   : > { %p198_p2 = pnand %p344_p0, %p197_p1 }
   0x5   : > { %p230_p3 = scmp.lt.s32.totalorder (!%p198_p2), %s340_s19, 1 }
   0x6   : > { %201 = sbr.rel (%p198_p2) target bundleno = 26 (0x1a), region = 40 }
   0xb   : > { %s441_s19 = smov (!%p230_p3, %s340_s19), 1  ;;  %v364_v0 = vld [vmem:[%s436_s2] ss:$0 sm:$0xff] }
   0xc   : > { %v365_v1 = vld [vmem:[%s437_s3] ss:$0 sm:$0xff]  ;;  %s353_s24 = sshll.u32 %s441_s19, 4 }
   0xd   : > { %s234_s27 = scalar_lea.vmem %s434_s0, %s353_s24  ;;  %s239_s30 = scalar_lea.vmem %s435_s1, %s353_s24  ;;  %v366_v8 = vld [vmem:[%s438_s4] ss:$0 sm:$0xff] }
   0xe   : > { %v245_v2 = vld [vmem:[%s234_s27] sm:$0xff]  ;;  %v246_v3 = vld [vmem:[%s234_s27 + $0x8] sm:$0xff]  ;;  %s244_s10 = scalar_lea.vmem %s439_s5, %s353_s24 }
   0xf   : > { %v253_v4 = vld [vmem:[%s239_s30] sm:$0xff]  ;;  %v251_v5 = vmul.f32 %v364_v0, %v245_v2  ;;  %v254_v6 = vld [vmem:[%s239_s30 + $0x8] sm:$0xff]  ;;  %v252_v9 = vmul.f32 %v364_v0, %v246_v3 }
  0x10   : > { %v259_v7 = vmul.f32 %v365_v1, %v253_v4  ;;  %v260_v10 = vmul.f32 %v365_v1, %v254_v6 }
  0x12   : > { %v261_v11 = vadd.f32 %v259_v7, %v251_v5  ;;  %v262_v12 = vadd.f32 %v260_v10, %v252_v9 }
  0x14   : > { %v267_v13 = vadd.f32 %v366_v8, %v261_v11  ;;  %v268_v14 = vadd.f32 %v366_v8, %v262_v12 }
  0x16   : > { %v269_v15 = vmax.f32 %v267_v13, 0.0  ;;  %v270_v16 = vmax.f32 %v268_v14, 0.0 }
  0x18   : > { %271 = vst [vmem:[%s244_s10] sm:$0xff] %v269_v15 }
  0x19   : > { %272 = vst [vmem:[%s244_s10 + $0x8] sm:$0xff] %v270_v16 }
  0x1a PF: > { %s15_s18 = sadd.s32 1, %s373_s18  }
  0x1b   : > { %p12_p4 = scmp.ge.s32.totalorder %s15_s18, 4  }
  0x1d   :  { %14 = sbr.rel (!%p12_p4) target bundleno = 1 (0x1), region = 73 }

// kernel: _lambda_.4
= control target key start
LH: loop header
LB: loop body
LE: loop exit
PB: predicated region body
PF: predicated region fallthrough
CT: control target
= control target key end

     0   :  { %s593_s24 = smov 0   ;;  %s654_s0 = inlined_call_operand.vmem [shape: f32[2,16,128], index: 0, kind: input, shape index: {}]   ;;  %s655_s1 = inlined_call_operand.vmem [shape: f32[2,16,128], index: 1, kind: input, shape index: {}]   ;;  %s656_s2 = inlined_call_operand.vmem [shape: f32[1,128], index: 2, kind: input, shape index: {}]   ;;  %s657_s3 = inlined_call_operand.vmem [shape: f32[1,128], index: 3, kind: input, shape index: {}]   ;;  %s658_s4 = inlined_call_operand.vmem [shape: f32[1,128], index: 4, kind: input, shape index: {}]   ;;  %s659_s5 = inlined_call_operand.vmem [shape: bf16[128,128], index: 5, kind: input, shape index: {}]   ;;  %s660_s6 = inlined_call_operand.vmem [shape: f32[1,128], index: 6, kind: input, shape index: {}]   ;;  %s661_s7 = inlined_call_operand.vmem [shape: f32[2,16,128], index: 7, kind: output, shape index: {}]  }
   0x1 LB: > { %s477_s25 = sadd.s32 4294967295, %s551_s24   ;;  %p481_p0 = scmp.ge.s32.totalorder %s551_s24, 1  ;;  %s551_s24 = sphi %s593_s24, %s17_s24  }
   0x2   : > { %p247_p1 = scmp.lt.s32.totalorder %s551_s24, 3 }
   0x4   : > { %p248_p2 = pnand %p481_p0, %p247_p1 }
   0x5   : > { %p284_p3 = scmp.lt.s32.totalorder (!%p248_p2), %s477_s25, 1 }
   0x6   : > { %251 = sbr.rel (%p248_p2) target bundleno = 180 (0xb4), region = 48 }
   0xb   : > { %v532_v0 = vld [vmem:[%s659_s5 + $0x38] sm:$0xff]  ;;  %v531_v1 = vld [vmem:[%s659_s5 + $0x30] sm:$0xff]  ;;  %s663_s25 = smov (!%p284_p3, %s477_s25), 1  ;;  %v530_v2 = vld [vmem:[%s659_s5 + $0x28] sm:$0xff] }
   0xc   : > { %394 = vmatpush.bf16.msra.mxu0 %v532_v0  ;;  %s607_s30 = sshll.u32 %s663_s25, 4  ;;  %v529_v3 = vld [vmem:[%s659_s5 + $0x20] sm:$0xff]  ;;  %v528_v14 = vld [vmem:[%s659_s5 + $0x18] sm:$0xff]  ;;  %v527_v18 = vld [vmem:[%s659_s5 + $0x10] sm:$0xff] }
   0xd   : > { %s288_s12 = scalar_lea.vmem %s654_s0, %s607_s30  ;;  %s293_s15 = scalar_lea.vmem %s655_s1, %s607_s30  ;;  %v541_v5 = vld [vmem:[%s656_s2] ss:$0 sm:$0xff]  ;;  %v526_v21 = vld [vmem:[%s659_s5 + $0x8] sm:$0xff] }
   0xe   : > { %v299_v4 = vld [vmem:[%s288_s12] sm:$0xff]  ;;  %v300_v7 = vld [vmem:[%s288_s12 + $0x8] sm:$0xff] }
   0xf   : > { %v542_v6 = vld [vmem:[%s657_s3] ss:$0 sm:$0xff]  ;;  %v308_v9 = vld [vmem:[%s293_s15 + $0x8] sm:$0xff]  ;;  %v305_v10 = vmul.f32 %v541_v5, %v299_v4  ;;  %v306_v11 = vmul.f32 %v541_v5, %v300_v7 }
  0x10   : > { %395 = vmatpush.bf16.msra.mxu0 %v531_v1  ;;  %v307_v8 = vld [vmem:[%s293_s15] sm:$0xff]  ;;  %v314_v13 = vmul.f32 %v542_v6, %v308_v9  ;;  %s298_s15 = scalar_lea.vmem %s661_s7, %s607_s30 }
  0x11   : > { %v313_v12 = vmul.f32 %v542_v6, %v307_v8  ;;  %v543_v17 = vld [vmem:[%s658_s4] ss:$0 sm:$0xff] }
  0x12   : > { %v316_v16 = vadd.f32 %v314_v13, %v306_v11  ;;  %v525_v24 = vld [vmem:[%s659_s5] sm:$0xff] }
  0x13   : > { %v315_v15 = vadd.f32 %v313_v12, %v305_v10  ;;  %v544_v26 = vld [vmem:[%s660_s6] ss:$0 sm:$0xff] }
  0x14   : > { %396 = vmatpush.bf16.msra.mxu0 %v530_v2  ;;  %v322_v20 = vadd.f32 %v543_v17, %v316_v16 }
  0x15   : > { %v321_v19 = vadd.f32 %v543_v17, %v315_v15 }
  0x16   : > { %v324_v23 = vmax.f32 %v322_v20, 0.0 }
  0x17   : > { %v323_v22 = vmax.f32 %v321_v19, 0.0 }
  0x18   : > { %397 = vmatpush.bf16.msra.mxu0 %v529_v3 }
  0x19   : > { %v325_v25 = vpack.c.bf16 %v324_v23, %v323_v22 }
  0x1c   : > { %398 = vmatpush.bf16.msra.mxu0 %v528_v14 }
  0x20   : > { %399 = vmatpush.bf16.msra.mxu0 %v527_v18 }
  0x24   : > { %400 = vmatpush.bf16.msra.mxu0 %v526_v21 }
  0x28   : > { %401 = vmatpush.bf16.msra.mxu0 %v525_v24 }
  0x2b   : > { %402 = vmatmul.bf16.vlgmr.msra.gmra.mxu0 %v325_v25 }
  0xa8   : > { %v403_v27 = vpop.f32.mrf.mxu0 }
  0xa9   : > { %v404_v28 = vadd.f32 %v544_v26, %v403_v27 }
  0xab   : > { %408 = vst [vmem:[%s298_s15] sm:$0xff] %v404_v28 }
  0xb0   : > { %v405_v29 = vpop.f32.mrf.mxu0 }
  0xb1   : > { %v406_v30 = vadd.f32 %v544_v26, %v405_v29 }
  0xb3   : > { %409 = vst [vmem:[%s298_s15 + $0x8] sm:$0xff] %v406_v30 }
  0xb4 PF: > { %s17_s24 = sadd.s32 1, %s551_s24  }
  0xb5   : > { %p14_p4 = scmp.ge.s32.totalorder %s17_s24, 4  }
  0xb7   :  { %16 = sbr.rel (!%p14_p4) target bundleno = 1 (0x1), region = 81 }

// kernel: _lambda_.3
= control target key start
LH: loop header
LB: loop body
LE: loop exit
PB: predicated region body
PF: predicated region fallthrough
CT: control target
= control target key end

     0   :  { %13 = vsyncpa [#allocation3], 0  ;;  %s1915_s24 = smov 0   ;;  %s2369_s0 = inlined_call_operand.vmem [shape: bf16[2,16,65], index: 0, kind: input, shape index: {}]   ;;  %s2370_s1 = inlined_call_operand.vmem [shape: bf16[65,576], index: 1, kind: input, shape index: {}]   ;;  %s2371_s2 = inlined_call_operand.hbm [shape: bf16[65,640], index: 2, kind: input, shape index: {}]   ;;  %s2372_s3 = inlined_call_operand.vmem [shape: f32[3,16,16], index: 3, kind: input, shape index: {}]   ;;  %s2373_s4 = inlined_call_operand.vmem [shape: f32[1,128], index: 4, kind: input, shape index: {}]   ;;  %s2374_s5 = inlined_call_operand.vmem [shape: f32[2,16,128], index: 5, kind: output, shape index: {0}]   ;;  %s2375_s6 = inlined_call_operand.vmem [shape: f32[2,16,128], index: 6, kind: output, shape index: {1}]   ;;  %s2376_s7 = inlined_call_operand.vmem [shape: f32[2,16,128], index: 7, kind: output, shape index: {2}]  }
   0x1 LB: > { %s226_s27 = sshll.u32 %s2371_s2, 4  ;;  %s1924_s28 = sadd.s32 4294967295, %s1866_s24   ;;  %s1866_s24 = sphi %s1915_s24, %s19_s24   ;;  %s227_s27 = int_to_ptr.hbm [resolvable:$true] %s226_s27 }
   0x2   : > { %p1482_p0 = scmp.ge.s32.totalorder %s1866_s24, 1  ;;  %p212_p1 = scmp.lt.s32.totalorder %s1866_s24, 3 }
   0x3   : > { %p1736_p2 = scmp.eq.s32.totalorder %s1924_s28, 0  ;;  %s1868_s29 = smov [#allocation2]  }
   0x4   : > { %p213_p3 = pnand %p1482_p0, %p212_p1  ;;  %s228_s30 = sshll.u32 %s1868_s29, 4  ;;  %s229_s30 = int_to_ptr.vmem [resolvable:$true] %s228_s30 }
   0x5   : > { %s1869_s8 = smov 320   ;;  %s1870_s9 = smov 20  }
   0x6   : > { %p1732_p4 = pneg %p213_p3  ;;  %258 = sbr.rel (%p213_p3) target bundleno = 895 (0x37f), region = 40 }
   0x8   : > { %p1733_p5 = pnand %p1736_p2, %p1732_p4 }
   0xa   : > { %1735 = dma.hbm_to_vmem [thread:$0]  (!%p1733_p5), %s227_s27, 2880, %s229_s30, [#allocation3], %s1869_s8, %s1869_s8, %s1870_s9  }
   0xb   : > { %1861 = dma.done.wait (%p1736_p2), [#allocation3], 2880  }
   0xc   : > { %1863 = vsyncadd (%p1736_p2), [#allocation3], 4294964416  ;;  %vm477_vm0 = vcmask 1040384   ;;  %v348_v0 = vld [vmem:[%s2370_s1 + $0xa0] sm:$0x11]  ;;  %v1871_v6 = vmov 0  }
   0xd   : > { %v349_v1 = vld [vmem:[%s2370_s1 + $0xa8] sm:$0x11]  ;;  %v423_v2 = vunpack.c.l.b16 %v348_v0  ;;  %v424_v3 = vunpack.c.h.b16 %v348_v0  ;;  %v1935_v7 = vsel %vm477_vm0, 65535, %v1871_v6  ;;  %v1561_v12 = vld [vmem:[%s2370_s1 + $0x78] sm:$0xf]  ;;  %p301_p6 = scmp.lt.s32.totalorder %s1924_s28, 1 }
   0xe   : > { %v425_v4 = vunpack.c.l.b16 %v349_v1  ;;  %v426_v5 = vunpack.c.h.b16 %v349_v1  ;;  %v1705_v13 = vld [vmem:[%s2370_s1 + $0x88] sm:$0xf0]  ;;  %v1703_v14 = vld [vmem:[%s2370_s1 + $0x7c] sm:$0xf]  ;;  %v1563_v15 = vld [vmem:[%s2370_s1 + $0x8c] sm:$0xf0] }
   0xf   : > { %v448_v8 = vpack.c.b16 %v423_v2, %v423_v2  ;;  %v449_v9 = vpack.c.b16 %v424_v3, %v424_v3  ;;  %v1569_v16 = vld [vmem:[%s2370_s1 + $0x80] sm:$0xf]  ;;  %v1706_v21 = vld [vmem:[%s2370_s1 + $0x90] sm:$0xf0]  ;;  %v1704_v22 = vld [vmem:[%s2370_s1 + $0x84] sm:$0xf]  ;;  %v1562_v24 = vor.u32 %v1705_v13, %v1561_v12  ;;  %v1566_v25 = vor.u32 %v1703_v14, %v1563_v15 }
  0x10   : > { %v450_v10 = vpack.c.b16 %v425_v4, %v425_v4  ;;  %v451_v11 = vpack.c.b16 %v426_v5, %v426_v5  ;;  %v1571_v23 = vld [vmem:[%s2370_s1 + $0x94] sm:$0xf0]  ;;  %v1541_v26 = vld [vmem:[%s2370_s1 + $0x50] sm:$0xf]  ;;  %v1700_v27 = vld [vmem:[%s2370_s1 + $0x60] sm:$0xf0]  ;;  %v1570_v28 = vor.u32 %v1706_v21, %v1569_v16 }
  0x11   : > { %v481_v17 = vand.u32 %v1935_v7, %v448_v8  ;;  %v484_v18 = vand.u32 %v1935_v7, %v449_v9  ;;  %v1574_v29 = vor.u32 %v1704_v22, %v1571_v23  ;;  %v1698_v30 = vld [vmem:[%s2370_s1 + $0x54] sm:$0xf]  ;;  %v1543_v31 = vld [vmem:[%s2370_s1 + $0x64] sm:$0xf0]  ;;  %v1549_v32 = vld [vmem:[%s2370_s1 + $0x58] sm:$0xf]  ;;  %v1542_v36 = vor.u32 %v1700_v27, %v1541_v26 }
  0x12   : > { %v487_v19 = vand.u32 %v1935_v7, %v450_v10  ;;  %v490_v20 = vand.u32 %v1935_v7, %v451_v11  ;;  %v1701_v33 = vld [vmem:[%s2370_s1 + $0x68] sm:$0xf0]  ;;  %v1699_v34 = vld [vmem:[%s2370_s1 + $0x5c] sm:$0xf]  ;;  %v1551_v35 = vld [vmem:[%s2370_s1 + $0x6c] sm:$0xf0]  ;;  %v1546_v37 = vor.u32 %v1698_v30, %v1543_v31 }
  0x13   : > { %498 = vmatpush.bf16.msra.mxu0 %v481_v17  ;;  %512 = vmatpush.bf16.msra.mxu1 %v484_v18  ;;  %s2378_s28 = smov (!%p301_p6, %s1924_s28), 1  ;;  %v1521_v38 = vld [vmem:[%s2370_s1 + $0x28] sm:$0xf]  ;;  %v1695_v39 = vld [vmem:[%s2370_s1 + $0x38] sm:$0xf0]  ;;  %v1550_v41 = vor.u32 %v1701_v33, %v1549_v32  ;;  %v1554_v42 = vor.u32 %v1699_v34, %v1551_v35  ;;  %vm473_vm1 = vcmask 531456  }
  0x14   : > { %526 = vmatpush.bf16.msra.mxu2 %v487_v19  ;;  %540 = vmatpush.bf16.msra.mxu3 %v490_v20  ;;  %v350_v40 = vld [vmem:[%s2370_s1 + $0xb0] sm:$0x1]  ;;  %v1693_v43 = vld [vmem:[%s2370_s1 + $0x2c] sm:$0xf]  ;;  %v1523_v44 = vld [vmem:[%s2370_s1 + $0x3c] sm:$0xf0]  ;;  %v1522_v51 = vor.u32 %v1695_v39, %v1521_v38 }
  0x15   : > { %v1529_v45 = vld [vmem:[%s2370_s1 + $0x30] sm:$0xf]  ;;  %v1696_v46 = vld [vmem:[%s2370_s1 + $0x40] sm:$0xf0]  ;;  %v1694_v47 = vld [vmem:[%s2370_s1 + $0x34] sm:$0xf]  ;;  %v427_v49 = vunpack.c.l.b16 %v350_v40  ;;  %v1526_v52 = vor.u32 %v1693_v43, %v1523_v44 }
  0x16   : > { %v1531_v48 = vld [vmem:[%s2370_s1 + $0x44] sm:$0xf0]  ;;  %s1683_s22 = sshll.u32 %s2378_s28, 3  ;;  %v2023_v50 = vld [vmem:[#allocation2 + $0xa0] sm:$0x11]  ;;  %v1530_v56 = vor.u32 %v1696_v46, %v1529_v45  ;;  %vm814_vm2 = vcmask 261120  }
  0x17   : > { %499 = vmatpush.bf16.msra.mxu0 %v1562_v24  ;;  %513 = vmatpush.bf16.msra.mxu1 %v1566_v25  ;;  %v1501_v53 = vld [vmem:[%s2370_s1] sm:$0xf]  ;;  %v1690_v54 = vld [vmem:[%s2370_s1 + $0x10] sm:$0xf0]  ;;  %v660_v55 = vunpack.c.h.b16 %v2023_v50  ;;  %v1534_v57 = vor.u32 %v1694_v47, %v1531_v48  ;;  %v1688_v58 = vld [vmem:[%s2370_s1 + $0x4] sm:$0xf]  ;;  %v452_v0 = vpack.c.b16 %v427_v49, %v427_v49  ;;  %s305_s20 = scalar_lea.vmem %s2369_s0, %s1683_s22 }
  0x18   : > { %527 = vmatpush.bf16.msra.mxu2 %v1570_v28  ;;  %541 = vmatpush.bf16.msra.mxu3 %v1574_v29  ;;  %v1503_v59 = vld [vmem:[%s2370_s1 + $0x14] sm:$0xf0]  ;;  %v1509_v60 = vld [vmem:[%s2370_s1 + $0x8] sm:$0xf]  ;;  %v1691_v61 = vld [vmem:[%s2370_s1 + $0x18] sm:$0xf0]  ;;  %v1502_v2 = vor.u32 %v1690_v54, %v1501_v53 }
  0x19   : > { %v1689_v62 = vld [vmem:[%s2370_s1 + $0xc] sm:$0xf]  ;;  %v1511_v63 = vld [vmem:[%s2370_s1 + $0x1c] sm:$0xf0]  ;;  %v685_v1 = vpack.c.b16 %v660_v55, %v660_v55  ;;  %v1506_v3 = vor.u32 %v1688_v58, %v1503_v59  ;;  %v1510_v4 = vor.u32 %v1691_v61, %v1509_v60  ;;  %v493_v6 = vand.u32 %v1935_v7, %v452_v0  ;;  %v1577_v10 = vld [vmem:[%s2370_s1 + $0x88] sm:$0xf] }
  0x1a   : > { %v1514_v5 = vor.u32 %v1689_v62, %v1511_v63  ;;  %v2055_v9 = vld [vmem:[%s305_s20] sm:$0xff]  ;;  %v1707_v11 = vld [vmem:[%s2370_s1 + $0x98] sm:$0xf0]  ;;  %v1702_v14 = vld [vmem:[%s2370_s1 + $0x70] sm:$0xf0]  ;;  %s1872_s16 = smov 32  }
  0x1b   : > { %500 = vmatpush.bf16.msra.mxu0 %v1542_v36  ;;  %514 = vmatpush.bf16.msra.mxu1 %v1546_v37  ;;  %v713_v8 = vand.u32 %v685_v1, %v1935_v7  ;;  %v1578_v12 = vor.u32 %v1707_v11, %v1577_v10  ;;  %v1557_v13 = vld [vmem:[%s2370_s1 + $0x60] sm:$0xf]  ;;  %v2077_v15 = vld [vmem:[#allocation2 + $0xa8] sm:$0x11]  ;;  %v1537_v17 = vld [vmem:[%s2370_s1 + $0x38] sm:$0xf] }
  0x1c   : > { %528 = vmatpush.bf16.msra.mxu2 %v1550_v41  ;;  %542 = vmatpush.bf16.msra.mxu3 %v1554_v42  ;;  %v1558_v16 = vor.u32 %v1702_v14, %v1557_v13  ;;  %v1697_v18 = vld [vmem:[%s2370_s1 + $0x48] sm:$0xf0]  ;;  %v662_v19 = vunpack.c.h.b16 %v2077_v15  ;;  %v1517_v21 = vld [vmem:[%s2370_s1 + $0x10] sm:$0xf]  ;;  %v1692_v22 = vld [vmem:[%s2370_s1 + $0x20] sm:$0xf0]  ;;  %v661_v11 = vunpack.c.l.b16 %v2077_v15 }
  0x1d   : > { %v1538_v20 = vor.u32 %v1697_v18, %v1537_v17  ;;  %v1518_v24 = vor.u32 %v1692_v22, %v1517_v21  ;;  %v1723_v26 = vld [vmem:[#allocation2 + $0x7c] sm:$0xf]  ;;  %v1648_v27 = vld [vmem:[#allocation2 + $0x8c] sm:$0xf0]  ;;  %v1724_v28 = vld [vmem:[#allocation2 + $0x84] sm:$0xf] }
  0x1e   : > { %v687_v23 = vpack.c.b16 %v662_v19, %v662_v19  ;;  %v1651_v29 = vor.u32 %v1723_v26, %v1648_v27  ;;  %v1656_v30 = vld [vmem:[#allocation2 + $0x94] sm:$0xf0]  ;;  %v1718_v32 = vld [vmem:[#allocation2 + $0x54] sm:$0xf]  ;;  %v1628_v33 = vld [vmem:[#allocation2 + $0x64] sm:$0xf0]  ;;  %v686_v18 = vpack.c.b16 %v661_v11, %v661_v11 }
  0x1f   : > { %501 = vmatpush.bf16.msra.mxu0 %v1522_v51  ;;  %515 = vmatpush.bf16.msra.mxu1 %v1526_v52  ;;  %v1659_v31 = vor.u32 %v1724_v28, %v1656_v30  ;;  %v1719_v34 = vld [vmem:[#allocation2 + $0x5c] sm:$0xf]  ;;  %v1631_v35 = vor.u32 %v1718_v32, %v1628_v33  ;;  %v1636_v36 = vld [vmem:[#allocation2 + $0x6c] sm:$0xf0]  ;;  %v1713_v38 = vld [vmem:[#allocation2 + $0x2c] sm:$0xf] }
  0x20   : > { %529 = vmatpush.bf16.msra.mxu2 %v1530_v56  ;;  %543 = vmatpush.bf16.msra.mxu3 %v1534_v57  ;;  %v719_v25 = vand.u32 %v687_v23, %v1935_v7  ;;  %v1639_v37 = vor.u32 %v1719_v34, %v1636_v36  ;;  %v1608_v39 = vld [vmem:[#allocation2 + $0x3c] sm:$0xf0]  ;;  %v1714_v40 = vld [vmem:[#allocation2 + $0x34] sm:$0xf]  ;;  %v1616_v42 = vld [vmem:[#allocation2 + $0x44] sm:$0xf0]  ;;  %v716_v21 = vand.u32 %v686_v18, %v1935_v7 }
  0x21   : > { %v1611_v41 = vor.u32 %v1713_v38, %v1608_v39  ;;  %v1619_v43 = vor.u32 %v1714_v40, %v1616_v42  ;;  %v1708_v44 = vld [vmem:[#allocation2 + $0x4] sm:$0xf]  ;;  %v1588_v45 = vld [vmem:[#allocation2 + $0x14] sm:$0xf0]  ;;  %v1709_v46 = vld [vmem:[#allocation2 + $0xc] sm:$0xf] }
  0x22   : > { %v1591_v47 = vor.u32 %v1708_v44, %v1588_v45  ;;  %v1596_v48 = vld [vmem:[#allocation2 + $0x1c] sm:$0xf0]  ;;  %s1873_s17 = smov 96   ;;  %s1874_s18 = smov 64   ;;  %v1726_v32 = vld [vmem:[#allocation2 + $0x90] sm:$0xf0] }
  0x23   : > { %502 = vmatpush.bf16.msra.mxu0 %v1502_v2  ;;  %516 = vmatpush.bf16.msra.mxu1 %v1506_v3  ;;  %v1599_v49 = vor.u32 %v1709_v46, %v1596_v48  ;;  %v1634_v34 = vld [vmem:[#allocation2 + $0x58] sm:$0xf]  ;;  %v1614_v38 = vld [vmem:[#allocation2 + $0x30] sm:$0xf]  ;;  %v1716_v39 = vld [vmem:[#allocation2 + $0x40] sm:$0xf0] }
  0x24   : > { %530 = vmatpush.bf16.msra.mxu2 %v1510_v4  ;;  %544 = vmatpush.bf16.msra.mxu3 %v1514_v5  ;;  %v1615_v42 = vor.u32 %v1716_v39, %v1614_v38  ;;  %v1646_v44 = vld [vmem:[#allocation2 + $0x78] sm:$0xf]  ;;  %v1725_v45 = vld [vmem:[#allocation2 + $0x88] sm:$0xf0]  ;;  %s2148_s19 = sshll.u32 %s2378_s28, 4  ;;  %vm1053_vm3 = vcmask 130048  }
  0x25   : > { %v1647_v48 = vor.u32 %v1725_v45, %v1646_v44  ;;  %s315_s23 = scalar_lea.vmem %s2375_s6, %s2148_s19  ;;  %s320_s26 = scalar_lea.vmem %s2376_s7, %s2148_s19 }
  0x26   : > { %1579 = vmatmul.msk.bf16.vlgmr.msra.gmra.mxu0 %vm473_vm1, %v2055_v9  ;;  %1580 = vmatmul.msk.bf16.vlgmr.msra.gmra.mxu1 %vm473_vm1, %v2055_v9  ;;  %s310_s21 = scalar_lea.vmem %s2374_s5, %s2148_s19 }
  0x27   : > { %554 = vmatpush.bf16.msrb.mxu0 %v493_v6  ;;  %1581 = vmatmul.msk.bf16.vlgmr.msra.gmra.mxu2 %vm473_vm1, %v2055_v9 }
  0x28   : > { %741 = vmatpush.bf16.msrb.mxu2 %v713_v8  ;;  %1582 = vmatmul.msk.bf16.vlgmr.msra.gmra.mxu3 %vm473_vm1, %v2055_v9 }
  0x29   : > { %755 = vmatpush.bf16.msrb.mxu3 %v716_v21 }
  0x2b   : > { %555 = vmatpush.bf16.msrb.mxu0 %v1578_v12 }
  0x2c   : > { %742 = vmatpush.bf16.msrb.mxu2 %v1651_v29 }
  0x2f   : > { %556 = vmatpush.bf16.msrb.mxu0 %v1558_v16 }
  0x30   : > { %743 = vmatpush.bf16.msrb.mxu2 %v1631_v35  ;;  %v1721_v35 = vld [vmem:[#allocation2 + $0x68] sm:$0xf0] }
  0x31   : > { %v1635_v36 = vor.u32 %v1721_v35, %v1634_v34 }
  0x33   : > { %557 = vmatpush.bf16.msrb.mxu0 %v1538_v20 }
  0x34   : > { %744 = vmatpush.bf16.msrb.mxu2 %v1611_v41  ;;  %v1594_v41 = vld [vmem:[#allocation2 + $0x8] sm:$0xf] }
  0x37   : > { %558 = vmatpush.bf16.msrb.mxu0 %v1518_v24 }
  0x38   : > { %745 = vmatpush.bf16.msrb.mxu2 %v1591_v47 }
  0x3a   : > { %1583 = vmatmul.msk.bf16.vlgmr.msrb.gmra.mxu0 %vm473_vm1, %v2055_v9 }
  0x3b   : > { %769 = vmatpush.bf16.msra.mxu0 %v719_v25  ;;  %1665 = vmatmul.msk.bf16.vlgmr.msrb.gmra.mxu2 %vm473_vm1, %v2055_v9 }
  0x3f   : > { %770 = vmatpush.bf16.msra.mxu0 %v1659_v31  ;;  %v1654_v31 = vld [vmem:[#allocation2 + $0x80] sm:$0xf] }
  0x40   : > { %v1655_v33 = vor.u32 %v1726_v32, %v1654_v31 }
  0x42   : > { %756 = vmatpush.bf16.msrb.mxu3 %v1655_v33 }
  0x43   : > { %771 = vmatpush.bf16.msra.mxu0 %v1639_v37  ;;  %v659_v37 = vunpack.c.l.b16 %v2023_v50  ;;  %v1606_v50 = vld [vmem:[#allocation2 + $0x28] sm:$0xf] }
  0x45   : > { %v684_v40 = vpack.c.b16 %v659_v37, %v659_v37 }
  0x46   : > { %757 = vmatpush.bf16.msrb.mxu3 %v1635_v36 }
  0x47   : > { %772 = vmatpush.bf16.msra.mxu0 %v1619_v43  ;;  %v1711_v43 = vld [vmem:[#allocation2 + $0x18] sm:$0xf0]  ;;  %v710_v46 = vand.u32 %v684_v40, %v1935_v7 }
  0x48   : > { %v1595_v47 = vor.u32 %v1711_v43, %v1594_v41 }
  0x49   : > { %727 = vmatpush.bf16.msrb.mxu1 %v710_v46 }
  0x4a   : > { %758 = vmatpush.bf16.msrb.mxu3 %v1615_v42 }
  0x4b   : > { %773 = vmatpush.bf16.msra.mxu0 %v1599_v49  ;;  %v1626_v49 = vld [vmem:[#allocation2 + $0x50] sm:$0xf] }
  0x4d   : > { %728 = vmatpush.bf16.msrb.mxu1 %v1647_v48 }
  0x4e   : > { %1667 = vmatmul.msk.bf16.vlgmr.msra.gmra.mxu0 %vm473_vm1, %v2055_v9  ;;  %759 = vmatpush.bf16.msrb.mxu3 %v1595_v47 }
  0x51   : > { %1666 = vmatmul.msk.bf16.vlgmr.msrb.gmra.mxu3 %vm473_vm1, %v2055_v9 }
  0xa3   : > { %v504_v51 = vpop.f32.mrf.mxu0  ;;  %v518_v52 = vpop.f32.mrf.mxu1 }
  0xa4   : > { %v794_v53 = vpack.c.bf16 %v518_v52, %v504_v51  ;;  %v1720_v51 = vld [vmem:[#allocation2 + $0x60] sm:$0xf0] }
  0xa5   : > { %v1627_v52 = vor.u32 %v1720_v51, %v1626_v49 }
  0xa6   : > { %v811_v58 = vunpack.c.l.b16 %v794_v53  ;;  %v918_v59 = vunpack.c.h.b16 %v794_v53  ;;  %v1715_v53 = vld [vmem:[#allocation2 + $0x38] sm:$0xf0] }
  0xa7   : > { %729 = vmatpush.bf16.msrb.mxu1 %v1627_v52 }
  0xaa   : > { %v532_v54 = vpop.f32.mrf.mxu2 }
  0xab   : > { %v546_v55 = vpop.f32.mrf.mxu3  ;;  %v506_v56 = vpop.f32.mrf.mxu0  ;;  %v795_v63 = vpack.c.bf16 %v532_v54, %v532_v54 }
  0xac   : > { %v520_v57 = vpop.f32.mrf.mxu1  ;;  %v798_v2 = vpack.c.bf16 %v546_v55, %v532_v54  ;;  %v1607_v54 = vor.u32 %v1715_v53, %v1606_v50  ;;  %v591_v55 = vld [vmem:[#allocation2 + $0xb0] sm:$0x1] }
  0xad   : > { %v796_v60 = vpack.c.bf16 %v520_v57, %v506_v56  ;;  %v1028_v12 = vunpack.c.l.b16 %v795_v63  ;;  %v663_v56 = vunpack.c.l.b16 %v591_v55  ;;  %v1586_v57 = vld [vmem:[#allocation2] sm:$0xf]  ;;  %v1727_v63 = vld [vmem:[#allocation2 + $0x98] sm:$0xf0] }
  0xae   : > { %v804_v13 = vunpack.c.l.b16 %v798_v2  ;;  %v889_v28 = vunpack.c.h.b16 %v798_v2  ;;  %730 = vmatpush.bf16.msrb.mxu1 %v1607_v54  ;;  %v1722_v2 = vld [vmem:[#allocation2 + $0x70] sm:$0xf0] }
  0xaf   : > { %v812_v61 = vunpack.c.l.b16 %v796_v60  ;;  %v919_v62 = vunpack.c.h.b16 %v796_v60 }
  0xb1   : > { %v813_v0 = vpack.c.b16 %v812_v61, %v811_v58  ;;  %v920_v1 = vpack.c.b16 %v919_v62, %v918_v59  ;;  %v1710_v58 = vld [vmem:[#allocation2 + $0x10] sm:$0xf0]  ;;  %v688_v59 = vpack.c.b16 %v663_v56, %v663_v56  ;;  %v1662_v62 = vld [vmem:[#allocation2 + $0x88] sm:$0xf] }
  0xb2   : > { %v534_v3 = vpop.f32.mrf.mxu2  ;;  %v1587_v60 = vor.u32 %v1710_v58, %v1586_v57 }
  0xb3   : > { %v548_v4 = vpop.f32.mrf.mxu3  ;;  %892 = vrot.lane.b32.xlu2 %v813_v0, %s1872_s16  ;;  %839 = vrot.lane.b32.xlu0 %v813_v0, %s1873_s17  ;;  %v819_v5 = vsel %vm814_vm2, %v813_v0, 0  ;;  %v925_v6 = vsel %vm814_vm2, %v920_v1, 0  ;;  %v797_v8 = vpack.c.bf16 %v534_v3, %v534_v3  ;;  %v722_v61 = vand.u32 %v688_v59, %v1935_v7  ;;  %v1712_v7 = vld [vmem:[#allocation2 + $0x20] sm:$0xf0] }
  0xb4   : > { %v800_v10 = vpack.c.bf16 %v548_v4, %v534_v3  ;;  %828 = vmatpush.bf16.xpose.msra.mxu2 %v819_v5  ;;  %934 = vmatpush.bf16.xpose.msrb.mxu0 %v925_v6  ;;  %v1622_v4 = vld [vmem:[#allocation2 + $0x38] sm:$0xf]  ;;  %v1717_v5 = vld [vmem:[#allocation2 + $0x48] sm:$0xf0] }
  0xb5   : > { %v1029_v14 = vunpack.c.l.b16 %v797_v8  ;;  %731 = vmatpush.bf16.msrb.mxu1 %v1587_v60  ;;  %v1623_v6 = vor.u32 %v1717_v5, %v1622_v4 }
  0xb6   : > { %v805_v16 = vunpack.c.l.b16 %v800_v10  ;;  %v890_v27 = vunpack.c.h.b16 %v800_v10  ;;  %v1602_v10 = vld [vmem:[#allocation2 + $0x10] sm:$0xf] }
  0xb7   : > { %v560_v17 = vpop.f32.mrf.mxu0  ;;  %v1030_v19 = vpack.c.b16 %v1029_v14, %v1028_v12  ;;  %v1603_v11 = vor.u32 %v1712_v7, %v1602_v10 }
  0xb8   : > { %v806_v20 = vpack.c.b16 %v805_v16, %v804_v13  ;;  %v799_v23 = vpack.c.bf16 %v560_v17, %v560_v17  ;;  %v2111_v30 = vpack.c.b16 %v890_v27, %v889_v28  ;;  %1664 = vmatmul.msk.bf16.vlgmr.msrb.gmra.mxu1 %vm473_vm1, %v2055_v9 }
  0xb9   : > { %v1035_v22 = vsel %vm814_vm2, %v1030_v19, 0  ;;  %783 = vmatpush.bf16.msra.mxu1 %v722_v61 }
  0xba   : > { %837 = vrot.lane.b32.xlu1 %v806_v20, %s1874_s18  ;;  %v997_v25 = vunpack.c.l.b16 %v799_v23 }
  0xbb   : > { %863 = vrot.lane.b32.xlu2 %v806_v20, %s1872_s16  ;;  %807 = vrot.lane.b32.xlu0 %v806_v20, %s1873_s17 }
  0xbc   : > { %1044 = vmatpush.bf16.xpose.msra.mxu0 %v1035_v22 }
  0xbf   : > { %v562_v15 = vpop.f32.mrf.mxu0 }
  0xc0   : > { %v801_v24 = vpack.c.bf16 %v562_v15, %v562_v15 }
  0xc2   : > { %865 = vrot.lane.b32.xlu1 %v813_v0, %s1874_s18  ;;  %v998_v26 = vunpack.c.l.b16 %v801_v24  ;;  %v1663_v0 = vor.u32 %v1727_v63, %v1662_v62 }
  0xc3   : > { %1000 = vrot.lane.b32.xlu2 %v920_v1, %s1872_s16  ;;  %971 = vrot.lane.b32.xlu0 %v920_v1, %s1874_s18 }
  0xc4   : > { %v2109_v29 = vpack.c.b16 %v998_v26, %v997_v25  ;;  %784 = vmatpush.bf16.msra.mxu1 %v1663_v0 }
  0xca   : > { %916 = vrot.lane.b32.xlu1 %v2111_v30, %s1873_s17 }
  0xcb   : > { %1024 = vrot.lane.b32.xlu2 %v2109_v29, %s1873_s17  ;;  %969 = vrot.lane.b32.xlu0 %v2111_v30, %s1872_s16  ;;  %v775_v31 = vpop.f32.mrf.mxu0 }
  0xcc   : > { %1343 = vst [vmem:[%s315_s23] sm:$0xff] %v775_v31 }
  0xd2   : > { %945 = vrot.lane.b32.xlu1 %v920_v1, %s1873_s17  ;;  %v1642_v1 = vld [vmem:[#allocation2 + $0x60] sm:$0xf] }
  0xd3   : > { %943 = vrot.lane.b32.xlu0 %v2111_v30, %s1874_s18  ;;  %v1643_v3 = vor.u32 %v1722_v2, %v1642_v1  ;;  %v777_v34 = vpop.f32.mrf.mxu0 }
  0xd4   : > { %1344 = vst [vmem:[%s315_s23 + $0x8] sm:$0xff] %v777_v34  ;;  %v761_v35 = vpop.f32.mrf.mxu3 }
  0xd5   : > { %785 = vmatpush.bf16.msra.mxu1 %v1643_v3 }
  0xd9   : > { %786 = vmatpush.bf16.msra.mxu1 %v1623_v6 }
  0xdc   : > { %v763_v36 = vpop.f32.mrf.mxu3 }
  0xdd   : > { %787 = vmatpush.bf16.msra.mxu1 %v1603_v11  ;;  %v1315_v37 = vpack.c.bf16 %v763_v36, %v761_v35 }
  0xe0   : > { %1668 = vmatmul.msk.bf16.vlgmr.msra.gmra.mxu1 %vm473_vm1, %v2055_v9 }
 0x10d   : > { %v893_v8 = vpop.permute.xlu2 %892 }
 0x10e   : > { %v898_v16 = vsel %vm814_vm2, %v893_v8, 0 }
 0x115   : > { %v864_v12 = vpop.permute.xlu2 %863 }
 0x11d   : > { %v1001_v17 = vpop.permute.xlu2 %1000 }
 0x11e   : > { %v1006_v19 = vsel %vm814_vm2, %v1001_v17, 0 }
 0x125   : > { %v840_v13 = vpop.permute.xlu0 %839  ;;  %v1025_v28 = vpop.permute.xlu2 %1024 }
 0x126   : > { %v845_v14 = vsel %vm814_vm2, %v840_v13, 0 }
 0x127   : > { %854 = vmatpush.bf16.xpose.msra.mxu3 %v845_v14 }
 0x12c   : > { %v838_v18 = vpop.permute.xlu1 %837 }
 0x12d   : > { %v808_v20 = vpop.permute.xlu0 %807 }
 0x12e   : > { %1670 = vmatmul.msk.bf16.vlgmr.msra.gmra.mxu3 %vm814_vm2, %v838_v18  ;;  %1669 = vmatmul.msk.bf16.vlgmr.msra.gmra.mxu2 %vm814_vm2, %v808_v20 }
 0x12f   : > { %907 = vmatpush.bf16.xpose.msrb.mxu3 %v898_v16 }
 0x134   : > { %v866_v21 = vpop.permute.xlu1 %865 }
 0x135   : > { %v871_v9 = vsel %vm814_vm2, %v866_v21, 0  ;;  %v972_v22 = vpop.permute.xlu0 %971 }
 0x136   : > { %880 = vmatpush.bf16.xpose.msrb.mxu2 %v871_v9  ;;  %v977_v15 = vsel %vm814_vm2, %v972_v22, 0 }
 0x137   : > { %1015 = vmatpush.bf16.xpose.msra.mxu3 %v1006_v19 }
 0x13c   : > { %v917_v23 = vpop.permute.xlu1 %916 }
 0x13d   : > { %1673 = vmatmul.msk.bf16.vlgmr.msrb.gmra.mxu0 %vm814_vm2, %v917_v23  ;;  %v970_v24 = vpop.permute.xlu0 %969 }
 0x13e   : > { %986 = vmatpush.bf16.xpose.msra.mxu2 %v977_v15  ;;  %1672 = vmatmul.msk.bf16.vlgmr.msrb.gmra.mxu3 %vm814_vm2, %v2111_v30  ;;  %v747_v30 = vpop.f32.mrf.mxu2 }
 0x13f   : > { %1671 = vmatmul.msk.bf16.vlgmr.msrb.gmra.mxu2 %vm814_vm2, %v864_v12  ;;  %1326 = vmatpush.bf16.msrb.mxu3 %v1315_v37 }
 0x144   : > { %v946_v25 = vpop.permute.xlu1 %945 }
 0x145   : > { %v951_v26 = vsel %vm814_vm2, %v946_v25, 0  ;;  %v944_v27 = vpop.permute.xlu0 %943 }
 0x146   : > { %960 = vmatpush.bf16.xpose.msrb.mxu1 %v951_v26  ;;  %v749_v32 = vpop.f32.mrf.mxu2 }
 0x147   : > { %v1273_v33 = vpack.c.bf16 %v749_v32, %v747_v30 }
 0x14d   : > { %1674 = vmatmul.msk.bf16.vlgmr.msrb.gmra.mxu1 %vm814_vm2, %v944_v27  ;;  %1677 = vmatmul.msk.bf16.vlgmr.msra.gmra.mxu0 %vm814_vm2, %v1025_v28 }
 0x14e   : > { %1676 = vmatmul.msk.bf16.vlgmr.msra.gmra.mxu3 %vm814_vm2, %v2109_v29  ;;  %1284 = vmatpush.bf16.msra.mxu1 %v1273_v33  ;;  %v733_v29 = vpop.f32.mrf.mxu1 }
 0x14f   : > { %1675 = vmatmul.msk.bf16.vlgmr.msra.gmra.mxu2 %vm814_vm2, %v970_v24 }
 0x156   : > { %v735_v38 = vpop.f32.mrf.mxu1 }
 0x157   : > { %v1265_v39 = vpack.c.bf16 %v735_v38, %v733_v29 }
 0x159   : > { %1301 = vmatpush.bf16.msrb.mxu2 %v1265_v39 }
 0x15e   : > { %v789_v40 = vpop.f32.mrf.mxu1 }
 0x15f   : > { %1345 = vst [vmem:[%s320_s26] sm:$0xff] %v789_v40 }
 0x166   : > { %v791_v41 = vpop.f32.mrf.mxu1 }
 0x167   : > { %1346 = vst [vmem:[%s320_s26 + $0x8] sm:$0xff] %v791_v41 }
 0x1b1   : > { %v856_v42 = vpop.f32.mrf.mxu3  ;;  %v830_v43 = vpop.f32.mrf.mxu2 }
 0x1b2   : > { %v2158_v44 = vmul.f32 0.03125, %v856_v42  ;;  %v2160_v45 = vmul.f32 0.03125, %v830_v43 }
 0x1b4   : > { %v1060_v46 = vsel %vm1053_vm3, %v2158_v44, -inf  ;;  %v1054_v47 = vsel %vm1053_vm3, %v2160_v45, -inf }
 0x1b5   : > { %1061 = vmax.xlane.f32.xlu0 %v1060_v46  ;;  %1055 = vmax.xlane.f32.xlu1 %v1054_v47 }
 0x1b9   : > { %v858_v48 = vpop.f32.mrf.mxu3  ;;  %v832_v49 = vpop.f32.mrf.mxu2 }
 0x1ba   : > { %v936_v51 = vpop.f32.mrf.mxu0  ;;  %v2170_v53 = vmul.f32 0.03125, %v832_v49  ;;  %v2178_v60 = vmul.f32 0.03125, %v858_v48 }
 0x1bb   : > { %v2166_v50 = vmul.f32 0.03125, %v936_v51 }
 0x1bc   : > { %v1057_v59 = vsel %vm1053_vm3, %v2170_v53, -inf  ;;  %v1063_v1 = vsel %vm1053_vm3, %v2178_v60, -inf }
 0x1bd   : > { %v1078_v52 = vsel %vm1053_vm3, %v2166_v50, -inf }
 0x1be   : > { %1079 = vmax.xlane.f32.xlu2 %v1078_v52 }
 0x1c1   : > { %v909_v54 = vpop.f32.mrf.mxu3 }
 0x1c2   : > { %v882_v55 = vpop.f32.mrf.mxu2  ;;  %v2172_v56 = vmul.f32 0.03125, %v909_v54  ;;  %v938_v57 = vpop.f32.mrf.mxu0 }
 0x1c3   : > { %v2188_v5 = vmul.f32 0.03125, %v882_v55  ;;  %v2212_v15 = vmul.f32 0.03125, %v938_v57 }
 0x1c4   : > { %v1072_v58 = vsel %vm1053_vm3, %v2172_v56, -inf }
 0x1c5   : > { %1073 = vmax.xlane.f32.xlu1 %v1072_v58  ;;  %v1066_v11 = vsel %vm1053_vm3, %v2188_v5, -inf  ;;  %v1081_v27 = vsel %vm1053_vm3, %v2212_v15, -inf }
 0x1c6   : > { %1058 = vmax.xlane.f32.xlu2 %v1057_v59 }
 0x1c9   : > { %v911_v61 = vpop.f32.mrf.mxu3 }
 0x1ca   : > { %v884_v62 = vpop.f32.mrf.mxu2  ;;  %v1046_v63 = vpop.f32.mrf.mxu0  ;;  %v2186_v3 = vmul.f32 0.03125, %v911_v61 }
 0x1cb   : > { %v2180_v0 = vmul.f32 0.03125, %v1046_v63  ;;  %v2200_v16 = vmul.f32 0.03125, %v884_v62  ;;  %v962_v18 = vpop.f32.mrf.mxu1 }
 0x1cc   : > { %v1075_v7 = vsel %vm1053_vm3, %v2186_v3, -inf  ;;  %v2224_v30 = vmul.f32 0.03125, %v962_v18 }
 0x1cd   : > { %v1102_v2 = vsel %vm1053_vm3, %v2180_v0, -inf  ;;  %v1069_v9 = vsel %vm1053_vm3, %v2200_v16, -inf }
 0x1ce   : > { %1064 = vmax.xlane.f32.xlu2 %v1063_v1  ;;  %1103 = vmax.xlane.f32.xlu0 %v1102_v2  ;;  %v1084_v32 = vsel %vm1053_vm3, %v2224_v30, -inf }
 0x1d1   : > { %v1017_v4 = vpop.f32.mrf.mxu3 }
 0x1d2   : > { %v1048_v6 = vpop.f32.mrf.mxu0  ;;  %v988_v8 = vpop.f32.mrf.mxu2  ;;  %v2198_v13 = vmul.f32 0.03125, %v1017_v4 }
 0x1d3   : > { %v2190_v10 = vmul.f32 0.03125, %v1048_v6  ;;  %v2214_v23 = vmul.f32 0.03125, %v988_v8  ;;  %v964_v25 = vpop.f32.mrf.mxu1 }
 0x1d4   : > { %v1096_v20 = vsel %vm1053_vm3, %v2198_v13, -inf  ;;  %v2222_v28 = vmul.f32 0.03125, %v964_v25 }
 0x1d5   : > { %v1105_v12 = vsel %vm1053_vm3, %v2190_v10, -inf  ;;  %v1090_v26 = vsel %vm1053_vm3, %v2214_v23, -inf }
 0x1d6   : > { %1076 = vmax.xlane.f32.xlu2 %v1075_v7  ;;  %1067 = vmax.xlane.f32.xlu0 %v1066_v11  ;;  %v1087_v31 = vsel %vm1053_vm3, %v2222_v28, -inf }
 0x1d7   : > { %1106 = vmax.xlane.f32.xlu1 %v1105_v12 }
 0x1d9   : > { %v1019_v14 = vpop.f32.mrf.mxu3 }
 0x1da   : > { %v2202_v17 = vmul.f32 0.03125, %v1019_v14  ;;  %v990_v21 = vpop.f32.mrf.mxu2 }
 0x1db   : > { %v2210_v22 = vmul.f32 0.03125, %v990_v21 }
 0x1dc   : > { %v1099_v19 = vsel %vm1053_vm3, %v2202_v17, -inf }
 0x1dd   : > { %v1093_v24 = vsel %vm1053_vm3, %v2210_v22, -inf }
 0x1de   : > { %1097 = vmax.xlane.f32.xlu2 %v1096_v20  ;;  %1100 = vmax.xlane.f32.xlu0 %v1099_v19 }
 0x1df   : > { %1070 = vmax.xlane.f32.xlu1 %v1069_v9 }
 0x1e6   : > { %1094 = vmax.xlane.f32.xlu2 %v1093_v24  ;;  %1082 = vmax.xlane.f32.xlu0 %v1081_v27 }
 0x1e7   : > { %1091 = vmax.xlane.f32.xlu1 %v1090_v26 }
 0x1ee   : > { %1088 = vmax.xlane.f32.xlu2 %v1087_v31 }
 0x1ef   : > { %1085 = vmax.xlane.f32.xlu1 %v1084_v32 }
 0x228   : > { %v1056_v33 = vpop.xlane.xlu1 %1055  ;;  %v1062_v29 = vpop.xlane.xlu0 %1061 }
 0x229   : > { %v1108_v34 = vsub.f32 %v2160_v45, %v1056_v33  ;;  %v1110_v39 = vsub.f32 %v2158_v44, %v1062_v29 }
 0x22b   : > { %v1126_v35 = vmul.f32 1.442695, %v1108_v34  ;;  %v1130_v42 = vmul.f32 1.442695, %v1110_v39 }
 0x22d   : > { %1754 = vpow2.f32 %v1126_v35 }
 0x231   : > { %v1080_v36 = vpop.xlane.xlu2 %1079 }
 0x232   : > { %v1116_v37 = vsub.f32 %v2166_v50, %v1080_v36 }
 0x233   : > { %v2232_v38 = vpop.eup %1754 }
 0x234   : > { %v1142_v40 = vmul.f32 1.442695, %v1116_v37  ;;  %v1162_v41 = vsel %vm1053_vm3, %v2232_v38, 0.0 }
 0x235   : > { %1163 = vadd.xlane.f32.xlu0 %v1162_v41 }
 0x236   : > { %1756 = vpow2.f32 %v1142_v40 }
 0x237   : > { %1758 = vpow2.f32 %v1130_v42 }
 0x238   : > { %v1074_v43 = vpop.xlane.xlu1 %1073 }
 0x239   : > { %v1059_v46 = vpop.xlane.xlu2 %1058  ;;  %v1114_v48 = vsub.f32 %v2172_v56, %v1074_v43 }
 0x23a   : > { %v1109_v45 = vsub.f32 %v2170_v53, %v1059_v46 }
 0x23b   : > { %v1138_v51 = vmul.f32 1.442695, %v1114_v48 }
 0x23c   : > { %v2238_v47 = vpop.eup %1756  ;;  %v1128_v49 = vmul.f32 1.442695, %v1109_v45 }
 0x23d   : > { %v1186_v44 = vsel %vm1053_vm3, %v2238_v47, 0.0  ;;  %v2243_v52 = vpop.eup %1758 }
 0x23e   : > { %1760 = vpow2.f32 %v1128_v49  ;;  %1187 = vadd.xlane.f32.xlu2 %v1186_v44  ;;  %v1168_v56 = vsel %vm1053_vm3, %v2243_v52, 0.0 }
 0x23f   : > { %1762 = vpow2.f32 %v1138_v51 }
 0x241   : > { %v1065_v50 = vpop.xlane.xlu2 %1064  ;;  %v1104_v55 = vpop.xlane.xlu0 %1103 }
 0x242   : > { %v1111_v54 = vsub.f32 %v2178_v60, %v1065_v50  ;;  %v1124_v58 = vsub.f32 %v2180_v0, %v1104_v55 }
 0x244   : > { %v2246_v57 = vpop.eup %1760  ;;  %v1132_v53 = vmul.f32 1.442695, %v1111_v54  ;;  %v1158_v61 = vmul.f32 1.442695, %v1124_v58 }
 0x245   : > { %v1165_v59 = vsel %vm1053_vm3, %v2246_v57, 0.0  ;;  %v2253_v63 = vpop.eup %1762 }
 0x246   : > { %1764 = vpow2.f32 %v1132_v53  ;;  %1169 = vadd.xlane.f32.xlu2 %v1168_v56  ;;  %1166 = vadd.xlane.f32.xlu1 %v1165_v59  ;;  %v1180_v11 = vsel %vm1053_vm3, %v2253_v63, 0.0 }
 0x247   : > { %1766 = vpow2.f32 %v1158_v61 }
 0x249   : > { %v1077_v62 = vpop.xlane.xlu2 %1076  ;;  %v1068_v1 = vpop.xlane.xlu0 %1067 }
 0x24a   : > { %v1115_v60 = vsub.f32 %v2186_v3, %v1077_v62  ;;  %v1107_v2 = vpop.xlane.xlu1 %1106  ;;  %v1112_v8 = vsub.f32 %v2188_v5, %v1068_v1 }
 0x24b   : > { %v1125_v4 = vsub.f32 %v2190_v10, %v1107_v2 }
 0x24c   : > { %v2257_v0 = vpop.eup %1764  ;;  %v1140_v6 = vmul.f32 1.442695, %v1115_v60  ;;  %v1134_v3 = vmul.f32 1.442695, %v1112_v8 }
 0x24d   : > { %v1160_v7 = vmul.f32 1.442695, %v1125_v4  ;;  %v1171_v12 = vsel %vm1053_vm3, %v2257_v0, 0.0  ;;  %v2264_v10 = vpop.eup %1766 }
 0x24e   : > { %1768 = vpow2.f32 %v1140_v6  ;;  %1181 = vadd.xlane.f32.xlu1 %v1180_v11  ;;  %1172 = vadd.xlane.f32.xlu0 %v1171_v12  ;;  %v1210_v27 = vsel %vm1053_vm3, %v2264_v10, 0.0 }
 0x24f   : > { %1770 = vpow2.f32 %v1160_v7 }
 0x250   : > { %1772 = vpow2.f32 %v1134_v3 }
 0x251   : > { %v1098_v14 = vpop.xlane.xlu2 %1097  ;;  %v1101_v19 = vpop.xlane.xlu0 %1100 }
 0x252   : > { %v1122_v18 = vsub.f32 %v2198_v13, %v1098_v14  ;;  %v1071_v20 = vpop.xlane.xlu1 %1070  ;;  %v1123_v24 = vsub.f32 %v2202_v17, %v1101_v19 }
 0x253   : > { %v1113_v5 = vsub.f32 %v2200_v16, %v1071_v20 }
 0x254   : > { %v2268_v21 = vpop.eup %1768  ;;  %v1154_v9 = vmul.f32 1.442695, %v1122_v18  ;;  %v1156_v16 = vmul.f32 1.442695, %v1123_v24 }
 0x255   : > { %v1136_v25 = vmul.f32 1.442695, %v1113_v5  ;;  %v1183_v26 = vsel %vm1053_vm3, %v2268_v21, 0.0  ;;  %v2275_v31 = vpop.eup %1770 }
 0x256   : > { %1774 = vpow2.f32 %v1154_v9  ;;  %1184 = vadd.xlane.f32.xlu2 %v1183_v26  ;;  %1211 = vadd.xlane.f32.xlu0 %v1210_v27  ;;  %v1213_v13 = vsel %vm1053_vm3, %v2275_v31, 0.0  ;;  %v2279_v17 = vpop.eup %1772 }
 0x257   : > { %1776 = vpow2.f32 %v1136_v25  ;;  %1214 = vadd.xlane.f32.xlu1 %v1213_v13  ;;  %v1174_v42 = vsel %vm1053_vm3, %v2279_v17, 0.0  ;;  %v1252_v25 = vld [vmem:[%s2372_s3] sm:$0xff]  ;;  %v1253_v13 = vld [vmem:[%s2372_s3 + $0x8] sm:$0xff] }
 0x258   : > { %1778 = vpow2.f32 %v1156_v16 }
 0x259   : > { %v1095_v32 = vpop.xlane.xlu2 %1094  ;;  %v1083_v35 = vpop.xlane.xlu0 %1082 }
 0x25a   : > { %v1121_v33 = vsub.f32 %v2210_v22, %v1095_v32  ;;  %v1092_v34 = vpop.xlane.xlu1 %1091  ;;  %v1117_v39 = vsub.f32 %v2212_v15, %v1083_v35 }
 0x25b   : > { %v1120_v29 = vsub.f32 %v2214_v23, %v1092_v34 }
 0x25c   : > { %v2283_v36 = vpop.eup %1774  ;;  %v1152_v37 = vmul.f32 1.442695, %v1121_v33  ;;  %v1144_v23 = vmul.f32 1.442695, %v1117_v39 }
 0x25d   : > { %v1150_v40 = vmul.f32 1.442695, %v1120_v29  ;;  %v1204_v41 = vsel %vm1053_vm3, %v2283_v36, 0.0  ;;  %v2290_v43 = vpop.eup %1776 }
 0x25e   : > { %1780 = vpow2.f32 %v1152_v37  ;;  %1205 = vadd.xlane.f32.xlu2 %v1204_v41  ;;  %1175 = vadd.xlane.f32.xlu0 %v1174_v42  ;;  %v1177_v22 = vsel %vm1053_vm3, %v2290_v43, 0.0  ;;  %v2294_v15 = vpop.eup %1778 }
 0x25f   : > { %1782 = vpow2.f32 %v1150_v40  ;;  %1178 = vadd.xlane.f32.xlu1 %v1177_v22  ;;  %v1207_v53 = vsel %vm1053_vm3, %v2294_v15, 0.0 }
 0x260   : > { %1784 = vpow2.f32 %v1144_v23 }
 0x261   : > { %v1089_v46 = vpop.xlane.xlu2 %1088 }
 0x262   : > { %v1119_v45 = vsub.f32 %v2222_v28, %v1089_v46  ;;  %v1086_v48 = vpop.xlane.xlu1 %1085 }
 0x263   : > { %v1118_v49 = vsub.f32 %v2224_v30, %v1086_v48 }
 0x264   : > { %v2298_v44 = vpop.eup %1780  ;;  %v1148_v51 = vmul.f32 1.442695, %v1119_v45 }
 0x265   : > { %v2300_v50 = vpop.eup %1782  ;;  %v1146_v54 = vmul.f32 1.442695, %v1118_v49  ;;  %v1201_v55 = vsel %vm1053_vm3, %v2298_v44, 0.0 }
 0x266   : > { %1786 = vpow2.f32 %v1148_v51  ;;  %1202 = vadd.xlane.f32.xlu2 %v1201_v55  ;;  %v1198_v28 = vsel %vm1053_vm3, %v2300_v50, 0.0  ;;  %1208 = vadd.xlane.f32.xlu0 %v1207_v53  ;;  %v2308_v30 = vpop.eup %1784  ;;  %v1256_v55 = vld [vmem:[%s2372_s3 + $0x20] sm:$0xff] }
 0x267   : > { %1788 = vpow2.f32 %v1146_v54  ;;  %1199 = vadd.xlane.f32.xlu1 %v1198_v28  ;;  %v1189_v61 = vsel %vm1053_vm3, %v2308_v30, 0.0 }
 0x26c   : > { %v2310_v58 = vpop.eup %1786 }
 0x26d   : > { %v2312_v56 = vpop.eup %1788  ;;  %v1195_v59 = vsel %vm1053_vm3, %v2310_v58, 0.0 }
 0x26e   : > { %1196 = vadd.xlane.f32.xlu2 %v1195_v59  ;;  %v1192_v62 = vsel %vm1053_vm3, %v2312_v56, 0.0  ;;  %1190 = vadd.xlane.f32.xlu0 %v1189_v61 }
 0x26f   : > { %1193 = vadd.xlane.f32.xlu1 %v1192_v62 }
 0x2a8   : > { %v1164_v1 = vpop.xlane.xlu0 %1163 }
 0x2a9   : > { %1790 = vrcp.f32 %v1164_v1  ;;  %v1254_v1 = vld [vmem:[%s2372_s3 + $0x10] sm:$0xff] }
 0x2af   : > { %v1791_v3 = vpop.eup %1790 }
 0x2b0   : > { %v1234_v24 = vmul.f32 %v1791_v3, %v2232_v38 }
 0x2b1   : > { %v1188_v60 = vpop.xlane.xlu2 %1187 }
 0x2b2   : > { %v1258_v32 = vadd.f32 %v1252_v25, %v1234_v24 }
 0x2b9   : > { %v1167_v2 = vpop.xlane.xlu1 %1166  ;;  %v1170_v4 = vpop.xlane.xlu2 %1169 }
 0x2ba   : > { %1792 = vrcp.f32 %v1167_v2 }
 0x2bb   : > { %1794 = vrcp.f32 %v1170_v4 }
 0x2c0   : > { %v1793_v19 = vpop.eup %1792 }
 0x2c1   : > { %v1182_v6 = vpop.xlane.xlu1 %1181  ;;  %v1173_v8 = vpop.xlane.xlu0 %1172  ;;  %v1235_v26 = vmul.f32 %v1793_v19, %v2246_v57 }
 0x2c2   : > { %1796 = vrcp.f32 %v1173_v8  ;;  %v1795_v20 = vpop.eup %1794 }
 0x2c3   : > { %v1236_v27 = vmul.f32 %v1795_v20, %v2243_v52  ;;  %v1259_v38 = vadd.f32 %v1253_v13, %v1235_v26 }
 0x2c5   : > { %v1260_v37 = vadd.f32 %v1258_v32, %v1236_v27 }
 0x2c8   : > { %v1797_v9 = vpop.eup %1796 }
 0x2c9   : > { %v1185_v7 = vpop.xlane.xlu2 %1184  ;;  %v1212_v11 = vpop.xlane.xlu0 %1211  ;;  %v1237_v16 = vmul.f32 %v1797_v9, %v2257_v0 }
 0x2ca   : > { %v1215_v12 = vpop.xlane.xlu1 %1214 }
 0x2cb   : > { %v1261_v52 = vadd.f32 %v1259_v38, %v1237_v16 }
 0x2d1   : > { %v1206_v14 = vpop.xlane.xlu2 %1205  ;;  %v1176_v18 = vpop.xlane.xlu0 %1175 }
 0x2d2   : > { %v1179_v5 = vpop.xlane.xlu1 %1178  ;;  %1798 = vrcp.f32 %v1176_v18 }
 0x2d3   : > { %1800 = vrcp.f32 %v1179_v5 }
 0x2d4   : > { %1802 = vrcp.f32 %v1182_v6 }
 0x2d5   : > { %1804 = vrcp.f32 %v1215_v12 }
 0x2d6   : > { %1806 = vrcp.f32 %v1206_v14 }
 0x2d8   : > { %v1799_v33 = vpop.eup %1798 }
 0x2d9   : > { %v1203_v34 = vpop.xlane.xlu2 %1202  ;;  %v1209_v35 = vpop.xlane.xlu0 %1208  ;;  %v1238_v57 = vmul.f32 %v1799_v33, %v2279_v17  ;;  %v1257_v17 = vld [vmem:[%s2372_s3 + $0x28] sm:$0xff] }
 0x2da   : > { %v1801_v29 = vpop.eup %1800  ;;  %1808 = vrcp.f32 %v1203_v34  ;;  %v1200_v40 = vpop.xlane.xlu1 %1199 }
 0x2db   : > { %v1239_v39 = vmul.f32 %v1801_v29, %v2290_v43  ;;  %1810 = vrcp.f32 %v1209_v35  ;;  %v1262_v41 = vadd.f32 %v1260_v37, %v1238_v57  ;;  %v1803_v0 = vpop.eup %1802 }
 0x2dc   : > { %1812 = vrcp.f32 %v1200_v40  ;;  %v1805_v22 = vpop.eup %1804 }
 0x2dd   : > { %1814 = vrcp.f32 %v1185_v7  ;;  %v1263_v42 = vadd.f32 %v1261_v52, %v1239_v39  ;;  %v1807_v23 = vpop.eup %1806  ;;  %v1251_v2 = vmul.f32 %v1805_v22, %v2275_v31 }
 0x2de   : > { %1816 = vrcp.f32 %v1212_v11  ;;  %v1248_v4 = vmul.f32 %v1807_v23, %v2283_v36 }
 0x2df   : > { %v1264_v46 = vpack.c.bf16 %v1263_v42, %v1262_v41  ;;  %1818 = vrcp.f32 %v1188_v60 }
 0x2e0   : > { %v1809_v45 = vpop.eup %1808 }
 0x2e1   : > { %v1811_v48 = vpop.eup %1810  ;;  %v1247_v43 = vmul.f32 %v1809_v45, %v2298_v44  ;;  %1679 = vmatmul.msk.bf16.vlgmr.msrb.gmra.mxu2 %vm1053_vm3, %v1264_v46  ;;  %v1197_v49 = vpop.xlane.xlu2 %1196  ;;  %v1240_v44 = vmul.f32 %v1803_v0, %v2253_v63 }
 0x2e2   : > { %v1191_v51 = vpop.xlane.xlu0 %1190  ;;  %v1813_v54 = vpop.eup %1812  ;;  %1820 = vrcp.f32 %v1197_v49  ;;  %v1249_v61 = vmul.f32 %v1811_v48, %v2294_v15  ;;  %v1255_v15 = vld [vmem:[%s2372_s3 + $0x18] sm:$0xff] }
 0x2e3   : > { %v1815_v53 = vpop.eup %1814  ;;  %v1309_v28 = vadd.f32 %v1257_v17, %v1247_v43  ;;  %v1246_v59 = vmul.f32 %v1813_v54, %v2300_v50  ;;  %v1194_v62 = vpop.xlane.xlu1 %1193  ;;  %1822 = vrcp.f32 %v1191_v51  ;;  %v1266_v14 = vadd.f32 %v1254_v1, %v1240_v44 }
 0x2e4   : > { %v1817_v60 = vpop.eup %1816  ;;  %1824 = vrcp.f32 %v1194_v62  ;;  %v1241_v50 = vmul.f32 %v1815_v53, %v2268_v21 }
 0x2e5   : > { %v1308_v6 = vadd.f32 %v1256_v55, %v1246_v59  ;;  %v1311_v8 = vadd.f32 %v1309_v28, %v1249_v61  ;;  %v1819_v7 = vpop.eup %1818  ;;  %v1250_v63 = vmul.f32 %v1817_v60, %v2264_v10 }
 0x2e6   : > { %v1242_v36 = vmul.f32 %v1819_v7, %v2238_v47  ;;  %v1267_v20 = vadd.f32 %v1255_v15, %v1241_v50 }
 0x2e7   : > { %v1310_v11 = vadd.f32 %v1308_v6, %v1248_v4  ;;  %v1313_v12 = vadd.f32 %v1311_v8, %v1251_v2 }
 0x2e8   : > { %v1821_v3 = vpop.eup %1820  ;;  %v1268_v25 = vadd.f32 %v1266_v14, %v1242_v36 }
 0x2e9   : > { %v1823_v18 = vpop.eup %1822  ;;  %v1312_v19 = vadd.f32 %v1310_v11, %v1250_v63  ;;  %v1245_v24 = vmul.f32 %v1821_v3, %v2310_v58 }
 0x2ea   : > { %v1825_v31 = vpop.eup %1824  ;;  %v1243_v5 = vmul.f32 %v1823_v18, %v2308_v30  ;;  %v1753_v30 = vld [vmem:[%s2373_s4] ss:$0 sm:$0xff] }
 0x2eb   : > { %v1244_v21 = vmul.f32 %v1825_v31, %v2312_v56  ;;  %v1314_v9 = vpack.c.bf16 %v1313_v12, %v1312_v19 }
 0x2ec   : > { %v1269_v10 = vadd.f32 %v1267_v20, %v1243_v5 }
 0x2ed   : > { %1680 = vmatmul.msk.bf16.vlgmr.msrb.gmra.mxu3 %vm1053_vm3, %v1314_v9  ;;  %v1270_v26 = vadd.f32 %v1268_v25, %v1244_v21 }
 0x2ee   : > { %v1271_v27 = vadd.f32 %v1269_v10, %v1245_v24 }
 0x2f0   : > { %v1272_v13 = vpack.c.bf16 %v1271_v27, %v1270_v26 }
 0x2f2   : > { %1678 = vmatmul.msk.bf16.vlgmr.msra.gmra.mxu1 %vm1053_vm3, %v1272_v13 }
 0x364   : > { %v1303_v16 = vpop.f32.mrf.mxu2 }
 0x36c   : > { %v1305_v38 = vpop.f32.mrf.mxu2 }
 0x36f   : > { %v1286_v47 = vpop.f32.mrf.mxu1 }
 0x370   : > { %v1304_v32 = vadd.f32 %v1303_v16, %v1286_v47  ;;  %v1328_v33 = vpop.f32.mrf.mxu3 }
 0x372   : > { %v1333_v56 = vadd.f32 %v1328_v33, %v1304_v32 }
 0x374   : > { %v1339_v58 = vadd.f32 %v1753_v30, %v1333_v56 }
 0x376   : > { %1341 = vst [vmem:[%s310_s21] sm:$0xff] %v1339_v58 }
 0x377   : > { %v1288_v34 = vpop.f32.mrf.mxu1 }
 0x378   : > { %v1306_v35 = vadd.f32 %v1305_v38, %v1288_v34  ;;  %v1330_v29 = vpop.f32.mrf.mxu3 }
 0x37a   : > { %v1334_v37 = vadd.f32 %v1330_v29, %v1306_v35 }
 0x37c   : > { %v1340_v57 = vadd.f32 %v1753_v30, %v1334_v37 }
 0x37e   : > { %1342 = vst [vmem:[%s310_s21 + $0x8] sm:$0xff] %v1340_v57 }
 0x37f PF: > { %s19_s24 = sadd.s32 1, %s1866_s24  }
 0x380   : > { %p16_p7 = scmp.ge.s32.totalorder %s19_s24, 4  }
 0x382   :  { %18 = sbr.rel (!%p16_p7) target bundleno = 1 (0x1), region = 99 }
 0x387   :  { %1400 = vsyncpa [#allocation3], 1 }
 0x388   :  { %1402 = vsyncpa [#allocation3 + $0x1], 1 }

</bundles_post_ra>
